<compile_context>
chip_gen: v5e
topology: v5e:2x2
jax: 0.10.0
libtpu: 0.0.40
codegen_flags: <defaults>
</compile_context>

<pallas_src>
import jax
import jax.numpy as jnp
from jax.experimental import pallas as pl
from jax.experimental.pallas import tpu as pltpu


def lstm_kernel(x_ref, w_ih_ref, w_hh_ref, b_ref, w_out_ref, b_out_ref,
                out_ref, gx_scr):
    TB, _ = x_ref.shape              # T*B rows, time-major
    H = w_hh_ref.shape[0]
    B = out_ref.shape[0]
    T = TB // B

    # Hoisted input projection: one big GEMM off the serial path.
    # gates_x[T*B, 4H] = x @ W_ih^T + (b_ih + b_hh)
    gx_scr[...] = (jnp.dot(x_ref[...], w_ih_ref[...],
                           preferred_element_type=jnp.float32)
                   + b_ref[...])

    w_hh = w_hh_ref[...]             # (H, 4H) bf16, loaded once

    h = jnp.zeros((B, H), jnp.float32)
    c = jnp.zeros((B, H), jnp.float32)

    # Serial recurrence, fully unrolled (T is small & static) so every slice
    # offset is static and the LLO scheduler can overlap consecutive steps.
    for t in range(T):
        gates = (gx_scr[pl.ds(t * B, B), :]
                 + jnp.dot(h.astype(w_hh.dtype), w_hh,
                           preferred_element_type=jnp.float32))
        i_g = jax.nn.sigmoid(gates[:, 0 * H:1 * H])
        f_g = jax.nn.sigmoid(gates[:, 1 * H:2 * H])
        g_g = jnp.tanh(gates[:, 2 * H:3 * H])
        o_g = jax.nn.sigmoid(gates[:, 3 * H:4 * H])
        c = f_g * c + i_g * g_g
        h = o_g * jnp.tanh(c)

    # Output Linear applied to the final hidden state (lane-dense, padded O).
    out_ref[...] = (jnp.dot(h.astype(w_out_ref.dtype), w_out_ref[...],
                            preferred_element_type=jnp.float32)
                    + b_out_ref[...]).astype(out_ref.dtype)


def lstm_forward(x, params):
    """x: (B, T, I) float32 (batch_first, as in the PyTorch module)."""
    w_ih, w_hh, b_all, w_out, b_out = params
    B, T, I = x.shape
    H = w_hh.shape[0]
    O = w_out.shape[1]
    O_pad = ((O + 127) // 128) * 128                 # 552 -> 640 (5 x 128)

    # Time-major, flattened rows so the input GEMM is a single MXU call.
    x_tm = jnp.transpose(x, (1, 0, 2)).reshape(T * B, I).astype(jnp.bfloat16)
    w_ih_b = w_ih.astype(jnp.bfloat16)
    w_hh_b = w_hh.astype(jnp.bfloat16)
    w_out_p = jnp.zeros((H, O_pad), jnp.bfloat16).at[:, :O].set(
        w_out.astype(jnp.bfloat16))
    b_out_p = jnp.zeros((1, O_pad), jnp.float32).at[0, :O].set(b_out)
    b_2d = b_all.reshape(1, 4 * H).astype(jnp.float32)

    vmem_spec = lambda: pl.BlockSpec(memory_space=pltpu.MemorySpace.VMEM)

    out_pad = pl.pallas_call(
        lstm_kernel,
        out_shape=jax.ShapeDtypeStruct((B, O_pad), jnp.float32),
        in_specs=[vmem_spec() for _ in range(6)],
        out_specs=vmem_spec(),
        scratch_shapes=[pltpu.VMEM((T * B, 4 * H), jnp.float32)],  # gates_x
    )(x_tm, w_ih_b, w_hh_b, b_2d, w_out_p, b_out_p)

    return out_pad[:, :O]
    # TODO(synk): on v7x a second independent sequence/layer could be mapped to
    # the idle TensorCore; with a single (B=2, T=8) sequence this stays 1-core.


def lstm_reference(x, params, matmul_dtype=jnp.float32):
    """Pure-JAX reference for torch.nn.LSTM + Linear semantics.

    matmul_dtype=bfloat16 mirrors the kernel's numerics (bf16 operands,
    f32 accumulation, f32 elementwise)."""
    w_ih, w_hh, b_all, w_out, b_out = params
    B, T, I = x.shape
    H = w_hh.shape[0]
    md = matmul_dtype

    def mm(a, b):
        return jnp.dot(a.astype(md), b.astype(md),
                       preferred_element_type=jnp.float32)

    h = jnp.zeros((B, H), jnp.float32)
    c = jnp.zeros((B, H), jnp.float32)
    for t in range(T):
        gates = mm(x[:, t, :], w_ih) + mm(h, w_hh) + b_all
        i_g = jax.nn.sigmoid(gates[:, 0 * H:1 * H])
        f_g = jax.nn.sigmoid(gates[:, 1 * H:2 * H])
        g_g = jnp.tanh(gates[:, 2 * H:3 * H])
        o_g = jax.nn.sigmoid(gates[:, 3 * H:4 * H])
        c = f_g * c + i_g * g_g
        h = o_g * jnp.tanh(c)
    return mm(h, w_out) + b_out


def init_params(key, input_size, hidden_size, output_size):
    """Deterministic synthetic parameters (shapes match nn.LSTM / nn.Linear)."""
    ks = jax.random.split(key, 7)
    H, I, O = hidden_size, input_size, output_size
    s_lstm = 1.0 / jnp.sqrt(H)
    s_lin = 1.0 / jnp.sqrt(H)
    # PyTorch stores weight_ih_l0 as (4H, I); we pre-transpose to (I, 4H).
    w_ih = jax.random.uniform(ks[0], (I, 4 * H), jnp.float32, -s_lstm, s_lstm)
    w_hh = jax.random.uniform(ks[1], (H, 4 * H), jnp.float32, -s_lstm, s_lstm)
    b_ih = jax.random.uniform(ks[2], (4 * H,), jnp.float32, -s_lstm, s_lstm)
    b_hh = jax.random.uniform(ks[3], (4 * H,), jnp.float32, -s_lstm, s_lstm)
    w_out = jax.random.uniform(ks[4], (H, O), jnp.float32, -s_lin, s_lin)
    b_out = jax.random.uniform(ks[5], (O,), jnp.float32, -s_lin, s_lin)
    return (w_ih, w_hh, b_ih + b_hh, w_out, b_out)


if __name__ == "__main__":
    INPUT_SIZE = 184
    HIDDEN_SIZE = 128
    OUTPUT_SIZE = 184 * 3
    B, T = 2, 8

    key = jax.random.PRNGKey(0)
    k_x, k_p = jax.random.split(key)
    x = jax.random.normal(k_x, (B, T, INPUT_SIZE), jnp.float32)
    params = init_params(k_p, INPUT_SIZE, HIDDEN_SIZE, OUTPUT_SIZE)

    out = jax.block_until_ready(lstm_forward(x, params))
    assert out.shape == (B, OUTPUT_SIZE)

    # Tight check against a reference that mirrors the kernel's bf16-matmul
    # numerics, plus a loose sanity check against the all-f32 reference.
    ref_bf16 = lstm_reference(x, params, matmul_dtype=jnp.bfloat16)
    ref_f32 = lstm_reference(x, params, matmul_dtype=jnp.float32)
    assert jnp.allclose(out, ref_bf16, atol=2e-3, rtol=2e-3), "mismatch (bf16 ref)"
    assert jnp.allclose(out, ref_f32, atol=5e-2, rtol=5e-2), "mismatch (f32 ref)"

    print("KERNEL_OK")
</pallas_src>

<mosaic_0001>
module attributes {stable_mosaic.version = 11 : i64} {
  func.func @lstm_kernel(%arg0: memref<16x184xbf16, #tpu.memory_space<vmem>>, %arg1: memref<184x512xbf16, #tpu.memory_space<vmem>>, %arg2: memref<128x512xbf16, #tpu.memory_space<vmem>>, %arg3: memref<1x512xf32, #tpu.memory_space<vmem>>, %arg4: memref<128x640xbf16, #tpu.memory_space<vmem>>, %arg5: memref<1x640xf32, #tpu.memory_space<vmem>>, %arg6: memref<2x640xf32, #tpu.memory_space<vmem>>, %arg7: memref<16x512xf32, #tpu.memory_space<vmem>>) attributes {dimension_semantics = [], scalar_prefetch = 0 : i64, scratch_operands = 1 : i64, tpu.core_type = #tpu.core_type<tc>} {
    %c0 = arith.constant 0 : index
    %c0_0 = arith.constant 0 : index
    %0 = vector.load %arg0[%c0, %c0_0] : memref<16x184xbf16, #tpu.memory_space<vmem>>, vector<16x184xbf16>
    %c0_1 = arith.constant 0 : index
    %c0_2 = arith.constant 0 : index
    %1 = vector.load %arg1[%c0_1, %c0_2] : memref<184x512xbf16, #tpu.memory_space<vmem>>, vector<184x512xbf16>
    %cst = arith.constant dense<0.000000e+00> : vector<16x512xf32>
    %2 = tpu.matmul %0, %1, %cst {dimension_numbers = #tpu.dot_dimension_numbers<[1], [0], [0], [1], [0, 0, 1, 1], [], []>} : vector<16x184xbf16>, vector<184x512xbf16>, vector<16x512xf32> -> vector<16x512xf32>
    %c0_3 = arith.constant 0 : index
    %c0_4 = arith.constant 0 : index
    %3 = vector.load %arg3[%c0_3, %c0_4] : memref<1x512xf32, #tpu.memory_space<vmem>>, vector<1x512xf32>
    %4 = vector.broadcast %3 : vector<1x512xf32> to vector<16x512xf32>
    %5 = arith.addf %2, %4 : vector<16x512xf32>
    %c0_5 = arith.constant 0 : index
    %c0_6 = arith.constant 0 : index
    %6 = vector.load %arg7[%c0_5, %c0_6] : memref<16x512xf32, #tpu.memory_space<vmem>>, vector<16x512xf32>
    tpu.vector_store %arg7[%c0_5, %c0_6], %5 {strides = array<i32>} : memref<16x512xf32, #tpu.memory_space<vmem>>, vector<16x512xf32>,
    %c0_7 = arith.constant 0 : index
    %c0_8 = arith.constant 0 : index
    %7 = vector.load %arg2[%c0_7, %c0_8] : memref<128x512xbf16, #tpu.memory_space<vmem>>, vector<128x512xbf16>
    %cst_9 = arith.constant 0.000000e+00 : f32
    %8 = vector.broadcast %cst_9 : f32 to vector<2x128xf32>
    %cst_10 = arith.constant 0.000000e+00 : f32
    %9 = vector.broadcast %cst_10 : f32 to vector<2x128xf32>
    %c0_11 = arith.constant 0 : index
    %c0_12 = arith.constant 0 : index
    %10 = vector.load %arg7[%c0_11, %c0_12] : memref<16x512xf32, #tpu.memory_space<vmem>>, vector<2x512xf32>
    %11 = arith.truncf %8 : vector<2x128xf32> to vector<2x128xbf16>
    %cst_13 = arith.constant dense<0.000000e+00> : vector<2x512xf32>
    %12 = tpu.matmul %11, %7, %cst_13 {dimension_numbers = #tpu.dot_dimension_numbers<[1], [0], [0], [1], [0, 0, 1, 1], [], []>} : vector<2x128xbf16>, vector<128x512xbf16>, vector<2x512xf32> -> vector<2x512xf32>
    %13 = arith.addf %10, %12 : vector<2x512xf32>
    %14 = vector.extract_strided_slice %13 {offsets = [0, 0], sizes = [2, 128], strides = [1, 1]} : vector<2x512xf32> to vector<2x128xf32>
    %15 = arith.negf %14 : vector<2x128xf32>
    %16 = math.exp %15 : vector<2x128xf32>
    %cst_14 = arith.constant 1.000000e+00 : f32
    %17 = vector.broadcast %cst_14 : f32 to vector<2x128xf32>
    %18 = arith.addf %17, %16 : vector<2x128xf32>
    %19 = arith.divf %17, %18 : vector<2x128xf32>
    %20 = vector.extract_strided_slice %13 {offsets = [0, 128], sizes = [2, 128], strides = [1, 1]} : vector<2x512xf32> to vector<2x128xf32>
    %21 = arith.negf %20 : vector<2x128xf32>
    %22 = math.exp %21 : vector<2x128xf32>
    %cst_15 = arith.constant 1.000000e+00 : f32
    %23 = vector.broadcast %cst_15 : f32 to vector<2x128xf32>
    %24 = arith.addf %23, %22 : vector<2x128xf32>
    %25 = arith.divf %23, %24 : vector<2x128xf32>
    %26 = vector.extract_strided_slice %13 {offsets = [0, 256], sizes = [2, 128], strides = [1, 1]} : vector<2x512xf32> to vector<2x128xf32>
    %27 = math.tanh %26 : vector<2x128xf32>
    %28 = vector.extract_strided_slice %13 {offsets = [0, 384], sizes = [2, 128], strides = [1, 1]} : vector<2x512xf32> to vector<2x128xf32>
    %29 = arith.negf %28 : vector<2x128xf32>
    %30 = math.exp %29 : vector<2x128xf32>
    %cst_16 = arith.constant 1.000000e+00 : f32
    %31 = vector.broadcast %cst_16 : f32 to vector<2x128xf32>
    %32 = arith.addf %31, %30 : vector<2x128xf32>
    %33 = arith.divf %31, %32 : vector<2x128xf32>
    %34 = arith.mulf %25, %9 : vector<2x128xf32>
    %35 = arith.mulf %19, %27 : vector<2x128xf32>
    %36 = arith.addf %34, %35 : vector<2x128xf32>
    %37 = math.tanh %36 : vector<2x128xf32>
    %38 = arith.mulf %33, %37 : vector<2x128xf32>
    %c2 = arith.constant 2 : index
    %c0_17 = arith.constant 0 : index
    %39 = vector.load %arg7[%c2, %c0_17] : memref<16x512xf32, #tpu.memory_space<vmem>>, vector<2x512xf32>
    %40 = arith.truncf %38 : vector<2x128xf32> to vector<2x128xbf16>
    %cst_18 = arith.constant dense<0.000000e+00> : vector<2x512xf32>
    %41 = tpu.matmul %40, %7, %cst_18 {dimension_numbers = #tpu.dot_dimension_numbers<[1], [0], [0], [1], [0, 0, 1, 1], [], []>} : vector<2x128xbf16>, vector<128x512xbf16>, vector<2x512xf32> -> vector<2x512xf32>
    %42 = arith.addf %39, %41 : vector<2x512xf32>
    %43 = vector.extract_strided_slice %42 {offsets = [0, 0], sizes = [2, 128], strides = [1, 1]} : vector<2x512xf32> to vector<2x128xf32>
    %44 = arith.negf %43 : vector<2x128xf32>
    %45 = math.exp %44 : vector<2x128xf32>
    %cst_19 = arith.constant 1.000000e+00 : f32
    %46 = vector.broadcast %cst_19 : f32 to vector<2x128xf32>
    %47 = arith.addf %46, %45 : vector<2x128xf32>
    %48 = arith.divf %46, %47 : vector<2x128xf32>
    %49 = vector.extract_strided_slice %42 {offsets = [0, 128], sizes = [2, 128], strides = [1, 1]} : vector<2x512xf32> to vector<2x128xf32>
    %50 = arith.negf %49 : vector<2x128xf32>
    %51 = math.exp %50 : vector<2x128xf32>
    %cst_20 = arith.constant 1.000000e+00 : f32
    %52 = vector.broadcast %cst_20 : f32 to vector<2x128xf32>
    %53 = arith.addf %52, %51 : vector<2x128xf32>
    %54 = arith.divf %52, %53 : vector<2x128xf32>
    %55 = vector.extract_strided_slice %42 {offsets = [0, 256], sizes = [2, 128], strides = [1, 1]} : vector<2x512xf32> to vector<2x128xf32>
    %56 = math.tanh %55 : vector<2x128xf32>
    %57 = vector.extract_strided_slice %42 {offsets = [0, 384], sizes = [2, 128], strides = [1, 1]} : vector<2x512xf32> to vector<2x128xf32>
    %58 = arith.negf %57 : vector<2x128xf32>
    %59 = math.exp %58 : vector<2x128xf32>
    %cst_21 = arith.constant 1.000000e+00 : f32
    %60 = vector.broadcast %cst_21 : f32 to vector<2x128xf32>
    %61 = arith.addf %60, %59 : vector<2x128xf32>
    %62 = arith.divf %60, %61 : vector<2x128xf32>
    %63 = arith.mulf %54, %36 : vector<2x128xf32>
    %64 = arith.mulf %48, %56 : vector<2x128xf32>
    %65 = arith.addf %63, %64 : vector<2x128xf32>
    %66 = math.tanh %65 : vector<2x128xf32>
    %67 = arith.mulf %62, %66 : vector<2x128xf32>
    %c4 = arith.constant 4 : index
    %c0_22 = arith.constant 0 : index
    %68 = vector.load %arg7[%c4, %c0_22] : memref<16x512xf32, #tpu.memory_space<vmem>>, vector<2x512xf32>
    %69 = arith.truncf %67 : vector<2x128xf32> to vector<2x128xbf16>
    %cst_23 = arith.constant dense<0.000000e+00> : vector<2x512xf32>
    %70 = tpu.matmul %69, %7, %cst_23 {dimension_numbers = #tpu.dot_dimension_numbers<[1], [0], [0], [1], [0, 0, 1, 1], [], []>} : vector<2x128xbf16>, vector<128x512xbf16>, vector<2x512xf32> -> vector<2x512xf32>
    %71 = arith.addf %68, %70 : vector<2x512xf32>
    %72 = vector.extract_strided_slice %71 {offsets = [0, 0], sizes = [2, 128], strides = [1, 1]} : vector<2x512xf32> to vector<2x128xf32>
    %73 = arith.negf %72 : vector<2x128xf32>
    %74 = math.exp %73 : vector<2x128xf32>
    %cst_24 = arith.constant 1.000000e+00 : f32
    %75 = vector.broadcast %cst_24 : f32 to vector<2x128xf32>
    %76 = arith.addf %75, %74 : vector<2x128xf32>
    %77 = arith.divf %75, %76 : vector<2x128xf32>
    %78 = vector.extract_strided_slice %71 {offsets = [0, 128], sizes = [2, 128], strides = [1, 1]} : vector<2x512xf32> to vector<2x128xf32>
    %79 = arith.negf %78 : vector<2x128xf32>
    %80 = math.exp %79 : vector<2x128xf32>
    %cst_25 = arith.constant 1.000000e+00 : f32
    %81 = vector.broadcast %cst_25 : f32 to vector<2x128xf32>
    %82 = arith.addf %81, %80 : vector<2x128xf32>
    %83 = arith.divf %81, %82 : vector<2x128xf32>
    %84 = vector.extract_strided_slice %71 {offsets = [0, 256], sizes = [2, 128], strides = [1, 1]} : vector<2x512xf32> to vector<2x128xf32>
    %85 = math.tanh %84 : vector<2x128xf32>
    %86 = vector.extract_strided_slice %71 {offsets = [0, 384], sizes = [2, 128], strides = [1, 1]} : vector<2x512xf32> to vector<2x128xf32>
    %87 = arith.negf %86 : vector<2x128xf32>
    %88 = math.exp %87 : vector<2x128xf32>
    %cst_26 = arith.constant 1.000000e+00 : f32
    %89 = vector.broadcast %cst_26 : f32 to vector<2x128xf32>
    %90 = arith.addf %89, %88 : vector<2x128xf32>
    %91 = arith.divf %89, %90 : vector<2x128xf32>
    %92 = arith.mulf %83, %65 : vector<2x128xf32>
    %93 = arith.mulf %77, %85 : vector<2x128xf32>
    %94 = arith.addf %92, %93 : vector<2x128xf32>
    %95 = math.tanh %94 : vector<2x128xf32>
    %96 = arith.mulf %91, %95 : vector<2x128xf32>
    %c6 = arith.constant 6 : index
    %c0_27 = arith.constant 0 : index
    %97 = vector.load %arg7[%c6, %c0_27] : memref<16x512xf32, #tpu.memory_space<vmem>>, vector<2x512xf32>
    %98 = arith.truncf %96 : vector<2x128xf32> to vector<2x128xbf16>
    %cst_28 = arith.constant dense<0.000000e+00> : vector<2x512xf32>
    %99 = tpu.matmul %98, %7, %cst_28 {dimension_numbers = #tpu.dot_dimension_numbers<[1], [0], [0], [1], [0, 0, 1, 1], [], []>} : vector<2x128xbf16>, vector<128x512xbf16>, vector<2x512xf32> -> vector<2x512xf32>
    %100 = arith.addf %97, %99 : vector<2x512xf32>
    %101 = vector.extract_strided_slice %100 {offsets = [0, 0], sizes = [2, 128], strides = [1, 1]} : vector<2x512xf32> to vector<2x128xf32>
    %102 = arith.negf %101 : vector<2x128xf32>
    %103 = math.exp %102 : vector<2x128xf32>
    %cst_29 = arith.constant 1.000000e+00 : f32
    %104 = vector.broadcast %cst_29 : f32 to vector<2x128xf32>
    %105 = arith.addf %104, %103 : vector<2x128xf32>
    %106 = arith.divf %104, %105 : vector<2x128xf32>
    %107 = vector.extract_strided_slice %100 {offsets = [0, 128], sizes = [2, 128], strides = [1, 1]} : vector<2x512xf32> to vector<2x128xf32>
    %108 = arith.negf %107 : vector<2x128xf32>
    %109 = math.exp %108 : vector<2x128xf32>
    %cst_30 = arith.constant 1.000000e+00 : f32
    %110 = vector.broadcast %cst_30 : f32 to vector<2x128xf32>
    %111 = arith.addf %110, %109 : vector<2x128xf32>
    %112 = arith.divf %110, %111 : vector<2x128xf32>
    %113 = vector.extract_strided_slice %100 {offsets = [0, 256], sizes = [2, 128], strides = [1, 1]} : vector<2x512xf32> to vector<2x128xf32>
    %114 = math.tanh %113 : vector<2x128xf32>
    %115 = vector.extract_strided_slice %100 {offsets = [0, 384], sizes = [2, 128], strides = [1, 1]} : vector<2x512xf32> to vector<2x128xf32>
    %116 = arith.negf %115 : vector<2x128xf32>
    %117 = math.exp %116 : vector<2x128xf32>
    %cst_31 = arith.constant 1.000000e+00 : f32
    %118 = vector.broadcast %cst_31 : f32 to vector<2x128xf32>
    %119 = arith.addf %118, %117 : vector<2x128xf32>
    %120 = arith.divf %118, %119 : vector<2x128xf32>
    %121 = arith.mulf %112, %94 : vector<2x128xf32>
    %122 = arith.mulf %106, %114 : vector<2x128xf32>
    %123 = arith.addf %121, %122 : vector<2x128xf32>
    %124 = math.tanh %123 : vector<2x128xf32>
    %125 = arith.mulf %120, %124 : vector<2x128xf32>
    %c8 = arith.constant 8 : index
    %c0_32 = arith.constant 0 : index
    %126 = vector.load %arg7[%c8, %c0_32] : memref<16x512xf32, #tpu.memory_space<vmem>>, vector<2x512xf32>
    %127 = arith.truncf %125 : vector<2x128xf32> to vector<2x128xbf16>
    %cst_33 = arith.constant dense<0.000000e+00> : vector<2x512xf32>
    %128 = tpu.matmul %127, %7, %cst_33 {dimension_numbers = #tpu.dot_dimension_numbers<[1], [0], [0], [1], [0, 0, 1, 1], [], []>} : vector<2x128xbf16>, vector<128x512xbf16>, vector<2x512xf32> -> vector<2x512xf32>
    %129 = arith.addf %126, %128 : vector<2x512xf32>
    %130 = vector.extract_strided_slice %129 {offsets = [0, 0], sizes = [2, 128], strides = [1, 1]} : vector<2x512xf32> to vector<2x128xf32>
    %131 = arith.negf %130 : vector<2x128xf32>
    %132 = math.exp %131 : vector<2x128xf32>
    %cst_34 = arith.constant 1.000000e+00 : f32
    %133 = vector.broadcast %cst_34 : f32 to vector<2x128xf32>
    %134 = arith.addf %133, %132 : vector<2x128xf32>
    %135 = arith.divf %133, %134 : vector<2x128xf32>
    %136 = vector.extract_strided_slice %129 {offsets = [0, 128], sizes = [2, 128], strides = [1, 1]} : vector<2x512xf32> to vector<2x128xf32>
    %137 = arith.negf %136 : vector<2x128xf32>
    %138 = math.exp %137 : vector<2x128xf32>
    %cst_35 = arith.constant 1.000000e+00 : f32
    %139 = vector.broadcast %cst_35 : f32 to vector<2x128xf32>
    %140 = arith.addf %139, %138 : vector<2x128xf32>
    %141 = arith.divf %139, %140 : vector<2x128xf32>
    %142 = vector.extract_strided_slice %129 {offsets = [0, 256], sizes = [2, 128], strides = [1, 1]} : vector<2x512xf32> to vector<2x128xf32>
    %143 = math.tanh %142 : vector<2x128xf32>
    %144 = vector.extract_strided_slice %129 {offsets = [0, 384], sizes = [2, 128], strides = [1, 1]} : vector<2x512xf32> to vector<2x128xf32>
    %145 = arith.negf %144 : vector<2x128xf32>
    %146 = math.exp %145 : vector<2x128xf32>
    %cst_36 = arith.constant 1.000000e+00 : f32
    %147 = vector.broadcast %cst_36 : f32 to vector<2x128xf32>
    %148 = arith.addf %147, %146 : vector<2x128xf32>
    %149 = arith.divf %147, %148 : vector<2x128xf32>
    %150 = arith.mulf %141, %123 : vector<2x128xf32>
    %151 = arith.mulf %135, %143 : vector<2x128xf32>
    %152 = arith.addf %150, %151 : vector<2x128xf32>
    %153 = math.tanh %152 : vector<2x128xf32>
    %154 = arith.mulf %149, %153 : vector<2x128xf32>
    %c10 = arith.constant 10 : index
    %c0_37 = arith.constant 0 : index
    %155 = vector.load %arg7[%c10, %c0_37] : memref<16x512xf32, #tpu.memory_space<vmem>>, vector<2x512xf32>
    %156 = arith.truncf %154 : vector<2x128xf32> to vector<2x128xbf16>
    %cst_38 = arith.constant dense<0.000000e+00> : vector<2x512xf32>
    %157 = tpu.matmul %156, %7, %cst_38 {dimension_numbers = #tpu.dot_dimension_numbers<[1], [0], [0], [1], [0, 0, 1, 1], [], []>} : vector<2x128xbf16>, vector<128x512xbf16>, vector<2x512xf32> -> vector<2x512xf32>
    %158 = arith.addf %155, %157 : vector<2x512xf32>
    %159 = vector.extract_strided_slice %158 {offsets = [0, 0], sizes = [2, 128], strides = [1, 1]} : vector<2x512xf32> to vector<2x128xf32>
    %160 = arith.negf %159 : vector<2x128xf32>
    %161 = math.exp %160 : vector<2x128xf32>
    %cst_39 = arith.constant 1.000000e+00 : f32
    %162 = vector.broadcast %cst_39 : f32 to vector<2x128xf32>
    %163 = arith.addf %162, %161 : vector<2x128xf32>
    %164 = arith.divf %162, %163 : vector<2x128xf32>
    %165 = vector.extract_strided_slice %158 {offsets = [0, 128], sizes = [2, 128], strides = [1, 1]} : vector<2x512xf32> to vector<2x128xf32>
    %166 = arith.negf %165 : vector<2x128xf32>
    %167 = math.exp %166 : vector<2x128xf32>
    %cst_40 = arith.constant 1.000000e+00 : f32
    %168 = vector.broadcast %cst_40 : f32 to vector<2x128xf32>
    %169 = arith.addf %168, %167 : vector<2x128xf32>
    %170 = arith.divf %168, %169 : vector<2x128xf32>
    %171 = vector.extract_strided_slice %158 {offsets = [0, 256], sizes = [2, 128], strides = [1, 1]} : vector<2x512xf32> to vector<2x128xf32>
    %172 = math.tanh %171 : vector<2x128xf32>
    %173 = vector.extract_strided_slice %158 {offsets = [0, 384], sizes = [2, 128], strides = [1, 1]} : vector<2x512xf32> to vector<2x128xf32>
    %174 = arith.negf %173 : vector<2x128xf32>
    %175 = math.exp %174 : vector<2x128xf32>
    %cst_41 = arith.constant 1.000000e+00 : f32
    %176 = vector.broadcast %cst_41 : f32 to vector<2x128xf32>
    %177 = arith.addf %176, %175 : vector<2x128xf32>
    %178 = arith.divf %176, %177 : vector<2x128xf32>
    %179 = arith.mulf %170, %152 : vector<2x128xf32>
    %180 = arith.mulf %164, %172 : vector<2x128xf32>
    %181 = arith.addf %179, %180 : vector<2x128xf32>
    %182 = math.tanh %181 : vector<2x128xf32>
    %183 = arith.mulf %178, %182 : vector<2x128xf32>
    %c12 = arith.constant 12 : index
    %c0_42 = arith.constant 0 : index
    %184 = vector.load %arg7[%c12, %c0_42] : memref<16x512xf32, #tpu.memory_space<vmem>>, vector<2x512xf32>
    %185 = arith.truncf %183 : vector<2x128xf32> to vector<2x128xbf16>
    %cst_43 = arith.constant dense<0.000000e+00> : vector<2x512xf32>
    %186 = tpu.matmul %185, %7, %cst_43 {dimension_numbers = #tpu.dot_dimension_numbers<[1], [0], [0], [1], [0, 0, 1, 1], [], []>} : vector<2x128xbf16>, vector<128x512xbf16>, vector<2x512xf32> -> vector<2x512xf32>
    %187 = arith.addf %184, %186 : vector<2x512xf32>
    %188 = vector.extract_strided_slice %187 {offsets = [0, 0], sizes = [2, 128], strides = [1, 1]} : vector<2x512xf32> to vector<2x128xf32>
    %189 = arith.negf %188 : vector<2x128xf32>
    %190 = math.exp %189 : vector<2x128xf32>
    %cst_44 = arith.constant 1.000000e+00 : f32
    %191 = vector.broadcast %cst_44 : f32 to vector<2x128xf32>
    %192 = arith.addf %191, %190 : vector<2x128xf32>
    %193 = arith.divf %191, %192 : vector<2x128xf32>
    %194 = vector.extract_strided_slice %187 {offsets = [0, 128], sizes = [2, 128], strides = [1, 1]} : vector<2x512xf32> to vector<2x128xf32>
    %195 = arith.negf %194 : vector<2x128xf32>
    %196 = math.exp %195 : vector<2x128xf32>
    %cst_45 = arith.constant 1.000000e+00 : f32
    %197 = vector.broadcast %cst_45 : f32 to vector<2x128xf32>
    %198 = arith.addf %197, %196 : vector<2x128xf32>
    %199 = arith.divf %197, %198 : vector<2x128xf32>
    %200 = vector.extract_strided_slice %187 {offsets = [0, 256], sizes = [2, 128], strides = [1, 1]} : vector<2x512xf32> to vector<2x128xf32>
    %201 = math.tanh %200 : vector<2x128xf32>
    %202 = vector.extract_strided_slice %187 {offsets = [0, 384], sizes = [2, 128], strides = [1, 1]} : vector<2x512xf32> to vector<2x128xf32>
    %203 = arith.negf %202 : vector<2x128xf32>
    %204 = math.exp %203 : vector<2x128xf32>
    %cst_46 = arith.constant 1.000000e+00 : f32
    %205 = vector.broadcast %cst_46 : f32 to vector<2x128xf32>
    %206 = arith.addf %205, %204 : vector<2x128xf32>
    %207 = arith.divf %205, %206 : vector<2x128xf32>
    %208 = arith.mulf %199, %181 : vector<2x128xf32>
    %209 = arith.mulf %193, %201 : vector<2x128xf32>
    %210 = arith.addf %208, %209 : vector<2x128xf32>
    %211 = math.tanh %210 : vector<2x128xf32>
    %212 = arith.mulf %207, %211 : vector<2x128xf32>
    %c14 = arith.constant 14 : index
    %c0_47 = arith.constant 0 : index
    %213 = vector.load %arg7[%c14, %c0_47] : memref<16x512xf32, #tpu.memory_space<vmem>>, vector<2x512xf32>
    %214 = arith.truncf %212 : vector<2x128xf32> to vector<2x128xbf16>
    %cst_48 = arith.constant dense<0.000000e+00> : vector<2x512xf32>
    %215 = tpu.matmul %214, %7, %cst_48 {dimension_numbers = #tpu.dot_dimension_numbers<[1], [0], [0], [1], [0, 0, 1, 1], [], []>} : vector<2x128xbf16>, vector<128x512xbf16>, vector<2x512xf32> -> vector<2x512xf32>
    %216 = arith.addf %213, %215 : vector<2x512xf32>
    %217 = vector.extract_strided_slice %216 {offsets = [0, 0], sizes = [2, 128], strides = [1, 1]} : vector<2x512xf32> to vector<2x128xf32>
    %218 = arith.negf %217 : vector<2x128xf32>
    %219 = math.exp %218 : vector<2x128xf32>
    %cst_49 = arith.constant 1.000000e+00 : f32
    %220 = vector.broadcast %cst_49 : f32 to vector<2x128xf32>
    %221 = arith.addf %220, %219 : vector<2x128xf32>
    %222 = arith.divf %220, %221 : vector<2x128xf32>
    %223 = vector.extract_strided_slice %216 {offsets = [0, 128], sizes = [2, 128], strides = [1, 1]} : vector<2x512xf32> to vector<2x128xf32>
    %224 = arith.negf %223 : vector<2x128xf32>
    %225 = math.exp %224 : vector<2x128xf32>
    %cst_50 = arith.constant 1.000000e+00 : f32
    %226 = vector.broadcast %cst_50 : f32 to vector<2x128xf32>
    %227 = arith.addf %226, %225 : vector<2x128xf32>
    %228 = arith.divf %226, %227 : vector<2x128xf32>
    %229 = vector.extract_strided_slice %216 {offsets = [0, 256], sizes = [2, 128], strides = [1, 1]} : vector<2x512xf32> to vector<2x128xf32>
    %230 = math.tanh %229 : vector<2x128xf32>
    %231 = vector.extract_strided_slice %216 {offsets = [0, 384], sizes = [2, 128], strides = [1, 1]} : vector<2x512xf32> to vector<2x128xf32>
    %232 = arith.negf %231 : vector<2x128xf32>
    %233 = math.exp %232 : vector<2x128xf32>
    %cst_51 = arith.constant 1.000000e+00 : f32
    %234 = vector.broadcast %cst_51 : f32 to vector<2x128xf32>
    %235 = arith.addf %234, %233 : vector<2x128xf32>
    %236 = arith.divf %234, %235 : vector<2x128xf32>
    %237 = arith.mulf %228, %210 : vector<2x128xf32>
    %238 = arith.mulf %222, %230 : vector<2x128xf32>
    %239 = arith.addf %237, %238 : vector<2x128xf32>
    %240 = math.tanh %239 : vector<2x128xf32>
    %241 = arith.mulf %236, %240 : vector<2x128xf32>
    %242 = arith.truncf %241 : vector<2x128xf32> to vector<2x128xbf16>
    %c0_52 = arith.constant 0 : index
    %c0_53 = arith.constant 0 : index
    %243 = vector.load %arg4[%c0_52, %c0_53] : memref<128x640xbf16, #tpu.memory_space<vmem>>, vector<128x640xbf16>
    %cst_54 = arith.constant dense<0.000000e+00> : vector<2x640xf32>
    %244 = tpu.matmul %242, %243, %cst_54 {dimension_numbers = #tpu.dot_dimension_numbers<[1], [0], [0], [1], [0, 0, 1, 1], [], []>} : vector<2x128xbf16>, vector<128x640xbf16>, vector<2x640xf32> -> vector<2x640xf32>
    %c0_55 = arith.constant 0 : index
    %c0_56 = arith.constant 0 : index
    %245 = vector.load %arg5[%c0_55, %c0_56] : memref<1x640xf32, #tpu.memory_space<vmem>>, vector<1x640xf32>
    %246 = vector.broadcast %245 : vector<1x640xf32> to vector<2x640xf32>
    %247 = arith.addf %244, %246 : vector<2x640xf32>
    %c0_57 = arith.constant 0 : index
    %c0_58 = arith.constant 0 : index
    %248 = vector.load %arg6[%c0_57, %c0_58] : memref<2x640xf32, #tpu.memory_space<vmem>>, vector<2x640xf32>
    tpu.vector_store %arg6[%c0_57, %c0_58], %247 {strides = array<i32>} : memref<2x640xf32, #tpu.memory_space<vmem>>, vector<2x640xf32>,
    return
  }
}

</mosaic_0001>

<bundles_post_ra>
// kernel: tpu_custom_call.1
= control target key start
LH: loop header
LB: loop body
LE: loop exit
PB: predicated region body
PF: predicated region fallthrough
CT: control target
= control target key end

     0   :  { %11 = vsyncpa [#allocation4], 0  ;;  %s3630_s0 = inlined_call_operand.hbm [shape: bf16[16,184], index: 0, kind: input, shape index: {}]   ;;  %s3631_s1 = inlined_call_operand.hbm [shape: bf16[184,512], index: 1, kind: input, shape index: {}]   ;;  %s3632_s2 = inlined_call_operand.hbm [shape: bf16[128,512], index: 2, kind: input, shape index: {}]   ;;  %s3633_s3 = inlined_call_operand.hbm [shape: f32[1,512], index: 3, kind: input, shape index: {}]   ;;  %s3634_s4 = inlined_call_operand.hbm [shape: bf16[128,640], index: 4, kind: input, shape index: {}]   ;;  %s3635_s5 = inlined_call_operand.hbm [shape: f32[1,640], index: 5, kind: input, shape index: {}]   ;;  %s3636_s6 = inlined_call_operand.hbm [shape: f32[2,640], index: 6, kind: output, shape index: {}]  }
   0x1   :  { %12 = vsyncpa [#allocation7], 0 }
   0x2   :  { %13 = vsyncpa [#allocation10], 0 }
   0x3   :  { %14 = vsyncpa [#allocation13], 0  ;;  %s33_s23 = sshll.u32 %s3631_s1, 4  ;;  %s34_s23 = int_to_ptr.hbm [resolvable:$true] %s33_s23 }
   0x4   :  { %15 = vsyncpa [#allocation5], 0  ;;  %s3150_s24 = smov [#allocation6]   ;;  %s60_s28 = sshll.u32 %s3633_s3, 4  ;;  %s61_s28 = int_to_ptr.hbm [resolvable:$true] %s60_s28 }
   0x5   :  { %s35_s25 = sshll.u32 %s3150_s24, 4  ;;  %s3151_s29 = smov 256   ;;  %s36_s25 = int_to_ptr.vmem [resolvable:$true] %s35_s25 }
   0x6   :  { %s3152_s30 = smov 16   ;;  %s3153_s7 = smov [#allocation9]  }
   0x7   :  { %41 = dma.hbm_to_vmem [thread:$0]  %s34_s23, 5888, %s36_s25, [#allocation7], %s3151_s29, %s3151_s29, %s3152_s30  }
   0x8   :  { %s62_s8 = sshll.u32 %s3153_s7, 4  ;;  %s20_s11 = sshll.u32 %s3630_s0, 4  ;;  %s63_s8 = int_to_ptr.vmem [resolvable:$true] %s62_s8  ;;  %s21_s11 = int_to_ptr.hbm [resolvable:$true] %s20_s11 }
   0x9   :  { %65 = dma.hbm_to_vmem [thread:$0]  %s61_s28, 64, %s63_s8, [#allocation10]  }
   0xa   :  { %s3154_s1 = smov [#allocation3]   ;;  %s46_s3 = sshll.u32 %s3632_s2, 4  ;;  %s47_s3 = int_to_ptr.hbm [resolvable:$true] %s46_s3 }
   0xb   :  { %s22_s12 = sshll.u32 %s3154_s1, 4  ;;  %s3155_s15 = smov 128   ;;  %s23_s12 = int_to_ptr.vmem [resolvable:$true] %s22_s12 }
   0xc   :  { %s3156_s16 = smov 8   ;;  %s3157_s17 = smov [#allocation8]  }
   0xd   :  { %28 = dma.hbm_to_vmem [thread:$0]  %s21_s11, 256, %s23_s12, [#allocation4], %s3155_s15, %s3155_s15, %s3156_s16  }
   0xe   :  { %s48_s18 = sshll.u32 %s3157_s17, 4  ;;  %s70_s0 = sshll.u32 %s3634_s4, 4  ;;  %s49_s18 = int_to_ptr.vmem [resolvable:$true] %s48_s18  ;;  %s71_s0 = int_to_ptr.hbm [resolvable:$true] %s70_s0 }
   0xf   :  { %54 = dma.hbm_to_vmem [thread:$0]  %s47_s3, 4096, %s49_s18, [#allocation7], %s3151_s29, %s3151_s29, %s3152_s30  }
  0x10   :  { %s3158_s21 = smov [#allocation11]   ;;  %s84_s2 = sshll.u32 %s3635_s5, 4  ;;  %s85_s2 = int_to_ptr.hbm [resolvable:$true] %s84_s2 }
  0x11   :  { %s72_s22 = sshll.u32 %s3158_s21, 4  ;;  %s3159_s25 = smov 320   ;;  %s73_s22 = int_to_ptr.vmem [resolvable:$true] %s72_s22 }
  0x12   :  { %s3160_s26 = smov 20   ;;  %s3161_s27 = smov [#allocation12]  }
  0x13   :  { %78 = dma.hbm_to_vmem [thread:$0]  %s71_s0, 5120, %s73_s22, [#allocation10], %s3159_s25, %s3159_s25, %s3160_s26  }
  0x14   :  { %s86_s28 = sshll.u32 %s3161_s27, 4  ;;  %s87_s28 = int_to_ptr.vmem [resolvable:$true] %s86_s28 }
  0x15   :  { %89 = dma.hbm_to_vmem [thread:$0]  %s85_s2, 80, %s87_s28, [#allocation13]  }
  0x16   :  { %3140 = dma.done.wait [#allocation4], 256  }
  0x17   :  { %3141 = vsyncadd [#allocation4], 4294967040 }
  0x18   :  { %3142 = dma.done.wait [#allocation7], 9984  }
  0x19   :  { %3143 = vsyncadd [#allocation7], 4294957312 }
  0x1a   :  { %3144 = dma.done.wait [#allocation10], 5184  }
  0x1b   :  { %3145 = vsyncadd [#allocation10], 4294962112 }
  0x1c   :  { %3146 = dma.done.wait [#allocation13], 80  }
  0x1d   :  { %3147 = vsyncadd [#allocation13], 4294967216  ;;  %v2334_v0 = vld [vmem:[#allocation6 + $0xe0] sm:$0xf]  ;;  %v2744_v1 = vld [vmem:[#allocation6 + $0xec] sm:$0xf0] }
  0x1e   :  { %v2742_v2 = vld [vmem:[#allocation6 + $0xe4] sm:$0xf]  ;;  %v2335_v3 = vor.u32 %v2744_v1, %v2334_v0  ;;  %v2336_v4 = vld [vmem:[#allocation6 + $0xf0] sm:$0xf0]  ;;  %v2318_v6 = vld [vmem:[#allocation6 + $0xc0] sm:$0xf] }
  0x1f   :  { %v161_v5 = vld [vmem:[#allocation6 + $0x160] sm:$0xff]  ;;  %v2339_v7 = vor.u32 %v2742_v2, %v2336_v4  ;;  %v2740_v10 = vld [vmem:[#allocation6 + $0xcc] sm:$0xf0]  ;;  %v2320_v12 = vld [vmem:[#allocation6 + $0xd0] sm:$0xf0]  ;;  %vm416_vm0 = vcmask 1043456  }
  0x20   :  { %v316_v8 = vunpack.c.l.b16 %v161_v5  ;;  %v317_v9 = vunpack.c.h.b16 %v161_v5  ;;  %v2738_v11 = vld [vmem:[#allocation6 + $0xc4] sm:$0xf]  ;;  %429 = vmatpush.bf16.msra.mxu0 %v2335_v3  ;;  %v2382_v13 = vld [vmem:[#allocation6 + $0x140] sm:$0xf]  ;;  %v2756_v14 = vld [vmem:[#allocation6 + $0x14c] sm:$0xf0]  ;;  %v2319_v17 = vor.u32 %v2740_v10, %v2318_v6 }
  0x21   :  { %457 = vmatpush.bf16.msra.mxu2 %v2339_v7  ;;  %v2323_v18 = vor.u32 %v2738_v11, %v2320_v12  ;;  %v2754_v19 = vld [vmem:[#allocation6 + $0x144] sm:$0xf]  ;;  %v2384_v20 = vld [vmem:[#allocation6 + $0x150] sm:$0xf0]  ;;  %v2302_v21 = vld [vmem:[#allocation6 + $0xa0] sm:$0xf]  ;;  %v2383_v27 = vor.u32 %v2756_v14, %v2382_v13 }
  0x22   :  { %v364_v15 = vpack.c.b16 %v316_v8, %v316_v8  ;;  %v365_v16 = vpack.c.b16 %v317_v9, %v317_v9  ;;  %v2736_v22 = vld [vmem:[#allocation6 + $0xac] sm:$0xf0]  ;;  %v2734_v23 = vld [vmem:[#allocation6 + $0xa4] sm:$0xf]  ;;  %v2304_v24 = vld [vmem:[#allocation6 + $0xb0] sm:$0xf0]  ;;  %v2387_v28 = vor.u32 %v2754_v19, %v2384_v20 }
  0x23   :  { %v2366_v29 = vld [vmem:[#allocation6 + $0x120] sm:$0xf]  ;;  %v2752_v30 = vld [vmem:[#allocation6 + $0x12c] sm:$0xf0]  ;;  %v2303_v31 = vor.u32 %v2736_v22, %v2302_v21  ;;  %v2307_v32 = vor.u32 %v2734_v23, %v2304_v24  ;;  %v2750_v33 = vld [vmem:[#allocation6 + $0x124] sm:$0xf] }
  0x24   :  { %v418_v25 = vsel %vm416_vm0, %v364_v15, 0  ;;  %v421_v26 = vsel %vm416_vm0, %v365_v16, 0  ;;  %430 = vmatpush.bf16.msra.mxu0 %v2319_v17  ;;  %v2368_v34 = vld [vmem:[#allocation6 + $0x130] sm:$0xf0]  ;;  %v2286_v35 = vld [vmem:[#allocation6 + $0x80] sm:$0xf]  ;;  %v2367_v39 = vor.u32 %v2752_v30, %v2366_v29 }
  0x25   :  { %447 = vmatpush.bf16.msra.mxu1 %v418_v25  ;;  %475 = vmatpush.bf16.msra.mxu3 %v421_v26  ;;  %v2732_v36 = vld [vmem:[#allocation6 + $0x8c] sm:$0xf0]  ;;  %v2730_v37 = vld [vmem:[#allocation6 + $0x84] sm:$0xf]  ;;  %v2288_v38 = vld [vmem:[#allocation6 + $0x90] sm:$0xf0]  ;;  %v2371_v40 = vor.u32 %v2750_v33, %v2368_v34 }
  0x26   :  { %458 = vmatpush.bf16.msra.mxu2 %v2323_v18  ;;  %v2350_v41 = vld [vmem:[#allocation6 + $0x100] sm:$0xf]  ;;  %v2748_v42 = vld [vmem:[#allocation6 + $0x10c] sm:$0xf0]  ;;  %v2746_v43 = vld [vmem:[#allocation6 + $0x104] sm:$0xf]  ;;  %v2287_v44 = vor.u32 %v2732_v36, %v2286_v35  ;;  %v2291_v45 = vor.u32 %v2730_v37, %v2288_v38 }
  0x27   :  { %v2352_v46 = vld [vmem:[#allocation6 + $0x110] sm:$0xf0]  ;;  %v2270_v47 = vld [vmem:[#allocation6 + $0x60] sm:$0xf]  ;;  %v3219_v48 = vld [vmem:[#allocation6 + $0x168] sm:$0xff]  ;;  %v2351_v55 = vor.u32 %v2748_v42, %v2350_v41  ;;  %vm412_vm1 = vcmask 457728  }
  0x28   :  { %431 = vmatpush.bf16.msra.mxu0 %v2303_v31  ;;  %v2728_v49 = vld [vmem:[#allocation6 + $0x6c] sm:$0xf0]  ;;  %v2726_v50 = vld [vmem:[#allocation6 + $0x64] sm:$0xf]  ;;  %v2272_v51 = vld [vmem:[#allocation6 + $0x70] sm:$0xf0]  ;;  %v318_v52 = vunpack.c.l.b16 %v3219_v48  ;;  %v2355_v56 = vor.u32 %v2746_v43, %v2352_v46  ;;  %v319_v18 = vunpack.c.h.b16 %v3219_v48 }
  0x29   :  { %448 = vmatpush.bf16.msra.mxu1 %v2383_v27  ;;  %476 = vmatpush.bf16.msra.mxu3 %v2387_v28  ;;  %v2342_v53 = vld [vmem:[#allocation6 + $0xe8] sm:$0xf]  ;;  %v2745_v54 = vld [vmem:[#allocation6 + $0xf4] sm:$0xf0]  ;;  %v2271_v58 = vor.u32 %v2728_v49, %v2270_v47  ;;  %v2275_v59 = vor.u32 %v2726_v50, %v2272_v51  ;;  %v2254_v60 = vld [vmem:[#allocation6 + $0x40] sm:$0xf] }
  0x2a   :  { %459 = vmatpush.bf16.msra.mxu2 %v2307_v32  ;;  %v366_v57 = vpack.c.b16 %v318_v52, %v318_v52  ;;  %v2724_v61 = vld [vmem:[#allocation6 + $0x4c] sm:$0xf0]  ;;  %v2722_v62 = vld [vmem:[#allocation6 + $0x44] sm:$0xf]  ;;  %v2343_v63 = vor.u32 %v2745_v54, %v2342_v53  ;;  %v2256_v0 = vld [vmem:[#allocation6 + $0x50] sm:$0xf0]  ;;  %v367_v31 = vpack.c.b16 %v319_v18, %v319_v18 }
  0x2b   :  { %v2326_v1 = vld [vmem:[#allocation6 + $0xc8] sm:$0xf]  ;;  %v2741_v2 = vld [vmem:[#allocation6 + $0xd4] sm:$0xf0]  ;;  %v2712_v6 = vld [vmem:[#allocation3 + $0x4] sm:$0xf]  ;;  %v2255_v8 = vor.u32 %v2724_v61, %v2254_v60  ;;  %v2259_v9 = vor.u32 %v2722_v62, %v2256_v0 }
  0x2c   :  { %432 = vmatpush.bf16.msra.mxu0 %v2287_v44  ;;  %v424_v3 = vsel %vm416_vm0, %v366_v57, 0  ;;  %v2390_v4 = vld [vmem:[#allocation6 + $0x148] sm:$0xf]  ;;  %v2757_v5 = vld [vmem:[#allocation6 + $0x154] sm:$0xf0]  ;;  %v2327_v13 = vor.u32 %v2741_v2, %v2326_v1  ;;  %s3163_s4 = smov [#allocation14]  }
  0x2d   :  { %449 = vmatpush.bf16.msra.mxu1 %v2367_v39  ;;  %477 = vmatpush.bf16.msra.mxu3 %v2371_v40  ;;  %v2216_v7 = vld [vmem:[#allocation3 + $0x8] sm:$0xf0]  ;;  %v2238_v10 = vld [vmem:[#allocation6 + $0x20] sm:$0xf]  ;;  %v2720_v11 = vld [vmem:[#allocation6 + $0x2c] sm:$0xf0]  ;;  %v2391_v14 = vor.u32 %v2757_v5, %v2390_v4 }
  0x2e   :  { %460 = vmatpush.bf16.msra.mxu2 %v2291_v45  ;;  %v3223_v12 = vor.u32 %v2712_v6, %v2216_v7  ;;  %v2718_v15 = vld [vmem:[#allocation6 + $0x24] sm:$0xf]  ;;  %v2240_v16 = vld [vmem:[#allocation6 + $0x30] sm:$0xf0]  ;;  %v2310_v17 = vld [vmem:[#allocation6 + $0xa8] sm:$0xf]  ;;  %v2239_v22 = vor.u32 %v2720_v11, %v2238_v10 }
  0x2f   :  { %v2737_v19 = vld [vmem:[#allocation6 + $0xb4] sm:$0xf0]  ;;  %v2374_v20 = vld [vmem:[#allocation6 + $0x128] sm:$0xf]  ;;  %v2243_v23 = vor.u32 %v2718_v15, %v2240_v16  ;;  %v2222_v24 = vld [vmem:[#allocation6] sm:$0xf] }
  0x30   :  { %433 = vmatpush.bf16.msra.mxu0 %v2271_v58  ;;  %v2753_v21 = vld [vmem:[#allocation6 + $0x134] sm:$0xf0]  ;;  %v2716_v25 = vld [vmem:[#allocation6 + $0xc] sm:$0xf0]  ;;  %v2311_v26 = vor.u32 %v2737_v19, %v2310_v17  ;;  %v2714_v28 = vld [vmem:[#allocation6 + $0x4] sm:$0xf] }
  0x31   :  { %450 = vmatpush.bf16.msra.mxu1 %v2351_v55  ;;  %478 = vmatpush.bf16.msra.mxu3 %v2355_v56  ;;  %v2375_v27 = vor.u32 %v2753_v21, %v2374_v20  ;;  %v2224_v29 = vld [vmem:[#allocation6 + $0x10] sm:$0xf0]  ;;  %v2294_v30 = vld [vmem:[#allocation6 + $0x88] sm:$0xf]  ;;  %v2733_v32 = vld [vmem:[#allocation6 + $0x94] sm:$0xf0]  ;;  %v2223_v38 = vor.u32 %v2716_v25, %v2222_v24 }
  0x32   :  { %461 = vmatpush.bf16.msra.mxu2 %v2275_v59  ;;  %v2358_v33 = vld [vmem:[#allocation6 + $0x108] sm:$0xf]  ;;  %v2749_v34 = vld [vmem:[#allocation6 + $0x114] sm:$0xf0]  ;;  %v2743_v35 = vld [vmem:[#allocation6 + $0xec] sm:$0xf]  ;;  %v2227_v39 = vor.u32 %v2714_v28, %v2224_v29  ;;  %v2295_v43 = vor.u32 %v2733_v32, %v2294_v30 }
  0x33   :  { %v2344_v36 = vld [vmem:[#allocation6 + $0xf8] sm:$0xf0]  ;;  %v2514_v37 = vld [vmem:[#allocation8 + $0xe0] sm:$0xf]  ;;  %v2788_v40 = vld [vmem:[#allocation8 + $0xec] sm:$0xf0]  ;;  %v2359_v44 = vor.u32 %v2749_v34, %v2358_v33 }
  0x34   :  { %2397 = vmatmul.msk.bf16.vlgmr.msra.gmra.mxu3 %vm412_vm1, %v3223_v12  ;;  %2396 = vmatmul.msk.bf16.vlgmr.msra.gmra.mxu1 %vm412_vm1, %v3223_v12  ;;  %v2214_v41 = vld [vmem:[#allocation3] sm:$0xf]  ;;  %v2713_v42 = vld [vmem:[#allocation3 + $0x4] sm:$0xf0]  ;;  %v427_v45 = vsel %vm416_vm0, %v367_v31, 0  ;;  %v2347_v46 = vor.u32 %v2743_v35, %v2344_v36  ;;  %v3231_v50 = vor.u32 %v2788_v40, %v2514_v37  ;;  %s2197_s5 = sshll.u32 %s3163_s4, 4  ;;  %s2198_s5 = int_to_ptr.vmem [resolvable:$true] %s2197_s5 }
  0x35   :  { %485 = vmatpush.bf16.msrb.mxu1 %v2343_v63  ;;  %503 = vmatpush.bf16.msrb.mxu3 %v424_v3  ;;  %v2278_v47 = vld [vmem:[#allocation6 + $0x68] sm:$0xf]  ;;  %v2729_v48 = vld [vmem:[#allocation6 + $0x74] sm:$0xf0]  ;;  %v2739_v49 = vld [vmem:[#allocation6 + $0xcc] sm:$0xf]  ;;  %v3233_v51 = vor.u32 %v2713_v42, %v2214_v41 }
  0x36   :  { %434 = vmatpush.bf16.msra.mxu0 %v2255_v8  ;;  %462 = vmatpush.bf16.msra.mxu2 %v2259_v9  ;;  %v2328_v52 = vld [vmem:[#allocation6 + $0xd8] sm:$0xf0]  ;;  %v2755_v53 = vld [vmem:[#allocation6 + $0x14c] sm:$0xf]  ;;  %v2498_v55 = vld [vmem:[#allocation8 + $0xc0] sm:$0xf]  ;;  %v2279_v57 = vor.u32 %v2729_v48, %v2278_v47 }
  0x37   :  { %v2392_v54 = vld [vmem:[#allocation6 + $0x158] sm:$0xf0]  ;;  %v2784_v56 = vld [vmem:[#allocation8 + $0xcc] sm:$0xf0]  ;;  %v2331_v58 = vor.u32 %v2739_v49, %v2328_v52  ;;  %v2262_v60 = vld [vmem:[#allocation6 + $0x48] sm:$0xf] }
  0x38   :  { %v2395_v59 = vor.u32 %v2755_v53, %v2392_v54  ;;  %v2725_v61 = vld [vmem:[#allocation6 + $0x54] sm:$0xf0]  ;;  %v2735_v62 = vld [vmem:[#allocation6 + $0xac] sm:$0xf]  ;;  %v3237_v63 = vor.u32 %v2784_v56, %v2498_v55  ;;  %v2312_v0 = vld [vmem:[#allocation6 + $0xb8] sm:$0xf0] }
  0x39   :  { %486 = vmatpush.bf16.msrb.mxu1 %v2327_v13  ;;  %504 = vmatpush.bf16.msrb.mxu3 %v2391_v14  ;;  %v2751_v1 = vld [vmem:[#allocation6 + $0x12c] sm:$0xf]  ;;  %v2376_v2 = vld [vmem:[#allocation6 + $0x138] sm:$0xf0]  ;;  %v2482_v3 = vld [vmem:[#allocation8 + $0xa0] sm:$0xf]  ;;  %v2263_v5 = vor.u32 %v2725_v61, %v2262_v60  ;;  %v2315_v7 = vor.u32 %v2735_v62, %v2312_v0 }
  0x3a   :  { %435 = vmatpush.bf16.msra.mxu0 %v2239_v22  ;;  %463 = vmatpush.bf16.msra.mxu2 %v2243_v23  ;;  %v2780_v4 = vld [vmem:[#allocation8 + $0xac] sm:$0xf0]  ;;  %v2246_v6 = vld [vmem:[#allocation6 + $0x28] sm:$0xf]  ;;  %v2379_v8 = vor.u32 %v2751_v1, %v2376_v2  ;;  %v2721_v9 = vld [vmem:[#allocation6 + $0x34] sm:$0xf0] }
  0x3b   :  { %v2731_v10 = vld [vmem:[#allocation6 + $0x8c] sm:$0xf]  ;;  %v2296_v11 = vld [vmem:[#allocation6 + $0x98] sm:$0xf0]  ;;  %v3241_v13 = vor.u32 %v2780_v4, %v2482_v3  ;;  %v2466_v16 = vld [vmem:[#allocation8 + $0x80] sm:$0xf]  ;;  %v2247_v20 = vor.u32 %v2721_v9, %v2246_v6 }
  0x3c   :  { %v2747_v14 = vld [vmem:[#allocation6 + $0x10c] sm:$0xf]  ;;  %v2360_v15 = vld [vmem:[#allocation6 + $0x118] sm:$0xf0]  ;;  %v2776_v17 = vld [vmem:[#allocation8 + $0x8c] sm:$0xf0]  ;;  %v2299_v22 = vor.u32 %v2731_v10, %v2296_v11 }
  0x3d   :  { %487 = vmatpush.bf16.msrb.mxu1 %v2311_v26  ;;  %505 = vmatpush.bf16.msrb.mxu3 %v2375_v27  ;;  %v2522_v18 = vld [vmem:[#allocation8 + $0xe8] sm:$0xf]  ;;  %v2789_v19 = vld [vmem:[#allocation8 + $0xf4] sm:$0xf0]  ;;  %v2363_v23 = vor.u32 %v2747_v14, %v2360_v15  ;;  %v2727_v25 = vld [vmem:[#allocation6 + $0x6c] sm:$0xf]  ;;  %v3246_v27 = vor.u32 %v2776_v17, %v2466_v16 }
  0x3e   :  { %436 = vmatpush.bf16.msra.mxu0 %v2223_v38  ;;  %464 = vmatpush.bf16.msra.mxu2 %v2227_v39  ;;  %v2230_v21 = vld [vmem:[#allocation6 + $0x8] sm:$0xf]  ;;  %v2717_v24 = vld [vmem:[#allocation6 + $0x14] sm:$0xf0]  ;;  %v2280_v26 = vld [vmem:[#allocation6 + $0x78] sm:$0xf0]  ;;  %v3248_v28 = vor.u32 %v2789_v19, %v2522_v18 }
  0x3f   :  { %v2450_v29 = vld [vmem:[#allocation8 + $0x60] sm:$0xf]  ;;  %v2786_v30 = vld [vmem:[#allocation8 + $0xe4] sm:$0xf]  ;;  %v2516_v31 = vld [vmem:[#allocation8 + $0xf0] sm:$0xf0]  ;;  %v2231_v35 = vor.u32 %v2717_v24, %v2230_v21  ;;  %v2283_v36 = vor.u32 %v2727_v25, %v2280_v26 }
  0x40   :  { %v2772_v32 = vld [vmem:[#allocation8 + $0x6c] sm:$0xf0]  ;;  %v2506_v33 = vld [vmem:[#allocation8 + $0xc8] sm:$0xf]  ;;  %v2785_v34 = vld [vmem:[#allocation8 + $0xd4] sm:$0xf0]  ;;  %v3250_v37 = vor.u32 %v2786_v30, %v2516_v31 }
  0x41   :  { %488 = vmatpush.bf16.msrb.mxu1 %v2295_v43  ;;  %506 = vmatpush.bf16.msrb.mxu3 %v2359_v44  ;;  %v2723_v38 = vld [vmem:[#allocation6 + $0x4c] sm:$0xf]  ;;  %v2264_v39 = vld [vmem:[#allocation6 + $0x58] sm:$0xf0]  ;;  %v3254_v40 = vor.u32 %v2772_v32, %v2450_v29  ;;  %v3256_v41 = vor.u32 %v2785_v34, %v2506_v33  ;;  %v2434_v42 = vld [vmem:[#allocation8 + $0x40] sm:$0xf] }
  0x42   :  { %513 = vmatpush.bf16.msrb.mxu0 %v2347_v46  ;;  %531 = vmatpush.bf16.msrb.mxu2 %v427_v45  ;;  %v2782_v43 = vld [vmem:[#allocation8 + $0xc4] sm:$0xf]  ;;  %v2500_v44 = vld [vmem:[#allocation8 + $0xd0] sm:$0xf0]  ;;  %v2768_v45 = vld [vmem:[#allocation8 + $0x4c] sm:$0xf0]  ;;  %v2267_v48 = vor.u32 %v2723_v38, %v2264_v39 }
  0x43   :  { %465 = vmatmul.bf16.vlgmr.msra.gmra.mxu2 %v3233_v51  ;;  %437 = vmatmul.bf16.vlgmr.msra.gmra.mxu0 %v3233_v51  ;;  %v2490_v46 = vld [vmem:[#allocation8 + $0xa8] sm:$0xf]  ;;  %v2781_v47 = vld [vmem:[#allocation8 + $0xb4] sm:$0xf0]  ;;  %v3259_v49 = vor.u32 %v2782_v43, %v2500_v44  ;;  %v2719_v52 = vld [vmem:[#allocation6 + $0x2c] sm:$0xf]  ;;  %v3263_v54 = vor.u32 %v2768_v45, %v2434_v42 }
  0x44   :  { %2398 = vmatmul.msk.bf16.vlgmr.msrb.gmra.mxu3 %vm412_vm1, %v3223_v12  ;;  %v2248_v53 = vld [vmem:[#allocation6 + $0x38] sm:$0xf0]  ;;  %v3265_v55 = vor.u32 %v2781_v47, %v2490_v46  ;;  %v2418_v56 = vld [vmem:[#allocation8 + $0x20] sm:$0xf]  ;;  %v2474_v60 = vld [vmem:[#allocation8 + $0x88] sm:$0xf] }
  0x45   :  { %745 = vmatpush.bf16.msra.mxu3 %v3231_v50  ;;  %489 = vmatpush.bf16.msrb.mxu1 %v2279_v57  ;;  %v2778_v57 = vld [vmem:[#allocation8 + $0xa4] sm:$0xf]  ;;  %v2777_v61 = vld [vmem:[#allocation8 + $0x94] sm:$0xf0]  ;;  %v2251_v62 = vor.u32 %v2719_v52, %v2248_v53  ;;  %v2715_v1 = vld [vmem:[#allocation6 + $0xc] sm:$0xf] }
  0x46   :  { %514 = vmatpush.bf16.msrb.mxu0 %v2331_v58  ;;  %532 = vmatpush.bf16.msrb.mxu2 %v2395_v59  ;;  %v2484_v58 = vld [vmem:[#allocation8 + $0xb0] sm:$0xf0]  ;;  %v2764_v59 = vld [vmem:[#allocation8 + $0x2c] sm:$0xf0]  ;;  %v2232_v2 = vld [vmem:[#allocation6 + $0x18] sm:$0xf0]  ;;  %v3277_v4 = vor.u32 %v2777_v61, %v2474_v60 }
  0x47   :  { %v3271_v0 = vor.u32 %v2778_v57, %v2484_v58  ;;  %v3275_v3 = vor.u32 %v2764_v59, %v2418_v56  ;;  %v2774_v6 = vld [vmem:[#allocation8 + $0x84] sm:$0xf]  ;;  %v2773_v9 = vld [vmem:[#allocation8 + $0x74] sm:$0xf0]  ;;  %v2787_v10 = vld [vmem:[#allocation8 + $0xec] sm:$0xf]  ;;  %v2235_v14 = vor.u32 %v2715_v1, %v2232_v2 }
  0x48   :  { %v2524_v11 = vld [vmem:[#allocation8 + $0xf8] sm:$0xf0]  ;;  %v2770_v18 = vld [vmem:[#allocation8 + $0x64] sm:$0xf]  ;;  %v2452_v19 = vld [vmem:[#allocation8 + $0x70] sm:$0xf0] }
  0x49   :  { %746 = vmatpush.bf16.msra.mxu3 %v3237_v63  ;;  %490 = vmatpush.bf16.msrb.mxu1 %v2263_v5  ;;  %v2402_v5 = vld [vmem:[#allocation8] sm:$0xf]  ;;  %v2442_v21 = vld [vmem:[#allocation8 + $0x48] sm:$0xf]  ;;  %v2508_v24 = vld [vmem:[#allocation8 + $0xd8] sm:$0xf0]  ;;  %v3291_v25 = vor.u32 %v2770_v18, %v2452_v19 }
  0x4a   :  { %515 = vmatpush.bf16.msrb.mxu0 %v2315_v7  ;;  %533 = vmatpush.bf16.msrb.mxu2 %v2379_v8  ;;  %v2468_v7 = vld [vmem:[#allocation8 + $0x90] sm:$0xf0]  ;;  %v2458_v8 = vld [vmem:[#allocation8 + $0x68] sm:$0xf]  ;;  %v2766_v29 = vld [vmem:[#allocation8 + $0x44] sm:$0xf] }
  0x4b   :  { %v3280_v15 = vor.u32 %v2774_v6, %v2468_v7  ;;  %v3286_v17 = vor.u32 %v2773_v9, %v2458_v8  ;;  %v2436_v30 = vld [vmem:[#allocation8 + $0x50] sm:$0xf0]  ;;  %v2426_v32 = vld [vmem:[#allocation8 + $0x28] sm:$0xf]  ;;  %v2765_v33 = vld [vmem:[#allocation8 + $0x34] sm:$0xf0] }
  0x4c   :  { %v2779_v34 = vld [vmem:[#allocation8 + $0xac] sm:$0xf]  ;;  %v3303_v38 = vor.u32 %v2766_v29, %v2436_v30  ;;  %v3306_v39 = vor.u32 %v2765_v33, %v2426_v32  ;;  %v2762_v42 = vld [vmem:[#allocation8 + $0x24] sm:$0xf]  ;;  %v2420_v43 = vld [vmem:[#allocation8 + $0x30] sm:$0xf0] }
  0x4d   :  { %747 = vmatpush.bf16.msra.mxu3 %v3241_v13  ;;  %491 = vmatpush.bf16.msrb.mxu1 %v2247_v20  ;;  %v3288_v20 = vor.u32 %v2787_v10, %v2524_v11  ;;  %v2410_v45 = vld [vmem:[#allocation8 + $0x8] sm:$0xf]  ;;  %v2775_v46 = vld [vmem:[#allocation8 + $0x8c] sm:$0xf]  ;;  %v2476_v47 = vld [vmem:[#allocation8 + $0x98] sm:$0xf0] }
  0x4e   :  { %516 = vmatpush.bf16.msrb.mxu0 %v2299_v22  ;;  %534 = vmatpush.bf16.msrb.mxu2 %v2363_v23  ;;  %v2769_v22 = vld [vmem:[#allocation8 + $0x54] sm:$0xf0]  ;;  %v2783_v23 = vld [vmem:[#allocation8 + $0xcc] sm:$0xf]  ;;  %v2758_v53 = vld [vmem:[#allocation8 + $0x4] sm:$0xf]  ;;  %v3319_v57 = vor.u32 %v2775_v46, %v2476_v47 }
  0x4f   :  { %v3295_v26 = vor.u32 %v2769_v22, %v2442_v21  ;;  %v3298_v31 = vor.u32 %v2783_v23, %v2508_v24  ;;  %v2404_v56 = vld [vmem:[#allocation8 + $0x10] sm:$0xf0]  ;;  %v2771_v58 = vld [vmem:[#allocation8 + $0x6c] sm:$0xf]  ;;  %v2460_v59 = vld [vmem:[#allocation8 + $0x78] sm:$0xf0] }
  0x50   :  { %v3323_v60 = vor.u32 %v2758_v53, %v2404_v56  ;;  %v3327_v61 = vor.u32 %v2771_v58, %v2460_v59  ;;  %v2444_v1 = vld [vmem:[#allocation8 + $0x58] sm:$0xf0]  ;;  %v163_v10 = vld [vmem:[#allocation9] sm:$0xf]  ;;  %s2199_s7 = sshll.u32 %s3636_s6, 4  ;;  %s2200_s7 = int_to_ptr.hbm [resolvable:$true] %s2199_s7 }
  0x51   :  { %748 = vmatpush.bf16.msra.mxu3 %v3246_v27  ;;  %492 = vmatpush.bf16.msrb.mxu1 %v2231_v35  ;;  %v2492_v35 = vld [vmem:[#allocation8 + $0xb8] sm:$0xf0]  ;;  %v165_v18 = vperm.slane %v163_v10, 0  ;;  %v166_v22 = vperm.slane %v163_v10, 1 }
  0x52   :  { %771 = vmatpush.bf16.msra.mxu2 %v3248_v28  ;;  %517 = vmatpush.bf16.msrb.mxu0 %v2283_v36  ;;  %v3162_v36 = vmov 0   ;;  %v3309_v44 = vor.u32 %v2779_v34, %v2492_v35  ;;  %v2428_v6 = vld [vmem:[#allocation8 + $0x38] sm:$0xf0] }
  0x53   :  { %2399 = vmatmul.msk.bf16.vlgmr.msrb.gmra.mxu2 %vm412_vm1, %v3223_v12  ;;  %v2760_v12 = vld [vmem:[#allocation8 + $0xc] sm:$0xf0]  ;;  %v2412_v8 = vld [vmem:[#allocation8 + $0x18] sm:$0xf0] }
  0x54   :  { %493 = vmatmul.bf16.vlgmr.msrb.gmra.mxu1 %v3233_v51  ;;  %v3284_v16 = vor.u32 %v2760_v12, %v2402_v5  ;;  %v2763_v5 = vld [vmem:[#allocation8 + $0x2c] sm:$0xf] }
  0x55   :  { %758 = vmatpush.bf16.msra.mxu1 %v3250_v37  ;;  %749 = vmatpush.bf16.msra.mxu3 %v3254_v40  ;;  %v3340_v7 = vor.u32 %v2763_v5, %v2428_v6  ;;  %v2759_v12 = vld [vmem:[#allocation8 + $0xc] sm:$0xf] }
  0x56   :  { %772 = vmatpush.bf16.msra.mxu2 %v3256_v41  ;;  %518 = vmatpush.bf16.msrb.mxu0 %v2267_v48  ;;  %v3313_v48 = vor.u32 %v2762_v42, %v2420_v43  ;;  %v3346_v9 = vor.u32 %v2759_v12, %v2412_v8  ;;  %v167_v43 = vperm.slane %v163_v10, 2 }
  0x59   :  { %759 = vmatpush.bf16.msra.mxu1 %v3259_v49  ;;  %750 = vmatpush.bf16.msra.mxu3 %v3263_v54 }
  0x5a   :  { %773 = vmatpush.bf16.msra.mxu2 %v3265_v55  ;;  %519 = vmatpush.bf16.msrb.mxu0 %v2251_v62  ;;  %v2767_v62 = vld [vmem:[#allocation8 + $0x4c] sm:$0xf] }
  0x5b   :  { %v3334_v2 = vor.u32 %v2767_v62, %v2444_v1  ;;  %v168_v1 = vperm.slane %v163_v10, 3 }
  0x5d   :  { %760 = vmatpush.bf16.msra.mxu1 %v3271_v0  ;;  %751 = vmatpush.bf16.msra.mxu3 %v3275_v3 }
  0x5e   :  { %774 = vmatpush.bf16.msra.mxu2 %v3277_v4  ;;  %520 = vmatpush.bf16.msrb.mxu0 %v2235_v14 }
  0x61   :  { %761 = vmatpush.bf16.msra.mxu1 %v3280_v15  ;;  %752 = vmatpush.bf16.msra.mxu3 %v3284_v16 }
  0x62   :  { %775 = vmatpush.bf16.msra.mxu2 %v3286_v17  ;;  %784 = vmatpush.bf16.msra.mxu0 %v3288_v20 }
  0x63   :  { %521 = vmatmul.bf16.vlgmr.msrb.gmra.mxu0 %v3233_v51  ;;  %v2761_v51 = vld [vmem:[#allocation8 + $0x14] sm:$0xf0] }
  0x64   :  { %753 = vmatmul.bf16.vlgmr.msra.gmra.mxu3 %v3162_v36  ;;  %v3316_v52 = vor.u32 %v2761_v51, %v2410_v45 }
  0x65   :  { %869 = vmatpush.bf16.msrb.mxu3 %v3231_v50  ;;  %762 = vmatpush.bf16.msra.mxu1 %v3291_v25 }
  0x66   :  { %776 = vmatpush.bf16.msra.mxu2 %v3295_v26  ;;  %785 = vmatpush.bf16.msra.mxu0 %v3298_v31 }
  0x69   :  { %870 = vmatpush.bf16.msrb.mxu3 %v3237_v63  ;;  %763 = vmatpush.bf16.msra.mxu1 %v3303_v38 }
  0x6a   :  { %777 = vmatpush.bf16.msra.mxu2 %v3306_v39  ;;  %786 = vmatpush.bf16.msra.mxu0 %v3309_v44 }
  0x6d   :  { %871 = vmatpush.bf16.msrb.mxu3 %v3241_v13  ;;  %764 = vmatpush.bf16.msra.mxu1 %v3313_v48 }
  0x6e   :  { %778 = vmatpush.bf16.msra.mxu2 %v3316_v52  ;;  %787 = vmatpush.bf16.msra.mxu0 %v3319_v57 }
  0x71   :  { %872 = vmatpush.bf16.msrb.mxu3 %v3246_v27  ;;  %765 = vmatpush.bf16.msra.mxu1 %v3323_v60 }
  0x72   :  { %895 = vmatpush.bf16.msrb.mxu2 %v3248_v28  ;;  %788 = vmatpush.bf16.msra.mxu0 %v3327_v61 }
  0x73   :  { %779 = vmatmul.bf16.vlgmr.msra.gmra.mxu2 %v3162_v36 }
  0x74   :  { %766 = vmatmul.bf16.vlgmr.msra.gmra.mxu1 %v3162_v36 }
  0x75   :  { %882 = vmatpush.bf16.msrb.mxu1 %v3250_v37  ;;  %873 = vmatpush.bf16.msrb.mxu3 %v3254_v40 }
  0x76   :  { %896 = vmatpush.bf16.msrb.mxu2 %v3256_v41  ;;  %789 = vmatpush.bf16.msra.mxu0 %v3334_v2 }
  0x79   :  { %883 = vmatpush.bf16.msrb.mxu1 %v3259_v49  ;;  %874 = vmatpush.bf16.msrb.mxu3 %v3263_v54 }
  0x7a   :  { %897 = vmatpush.bf16.msrb.mxu2 %v3265_v55  ;;  %790 = vmatpush.bf16.msra.mxu0 %v3340_v7 }
  0x7d   :  { %884 = vmatpush.bf16.msrb.mxu1 %v3271_v0  ;;  %875 = vmatpush.bf16.msrb.mxu3 %v3275_v3 }
  0x7e   :  { %898 = vmatpush.bf16.msrb.mxu2 %v3277_v4  ;;  %791 = vmatpush.bf16.msra.mxu0 %v3346_v9 }
  0x81   :  { %885 = vmatpush.bf16.msrb.mxu1 %v3280_v15  ;;  %876 = vmatpush.bf16.msrb.mxu3 %v3284_v16 }
  0x82   :  { %899 = vmatpush.bf16.msrb.mxu2 %v3286_v17  ;;  %908 = vmatpush.bf16.msrb.mxu0 %v3288_v20 }
  0x83   :  { %792 = vmatmul.bf16.vlgmr.msra.gmra.mxu0 %v3162_v36 }
  0x85   :  { %1011 = vmatpush.bf16.msra.mxu3 %v3231_v50  ;;  %886 = vmatpush.bf16.msrb.mxu1 %v3291_v25 }
  0x86   :  { %900 = vmatpush.bf16.msrb.mxu2 %v3295_v26  ;;  %909 = vmatpush.bf16.msrb.mxu0 %v3298_v31 }
  0x89   :  { %1012 = vmatpush.bf16.msra.mxu3 %v3237_v63  ;;  %887 = vmatpush.bf16.msrb.mxu1 %v3303_v38 }
  0x8a   :  { %901 = vmatpush.bf16.msrb.mxu2 %v3306_v39  ;;  %910 = vmatpush.bf16.msrb.mxu0 %v3309_v44 }
  0x8d   :  { %1013 = vmatpush.bf16.msra.mxu3 %v3241_v13  ;;  %888 = vmatpush.bf16.msrb.mxu1 %v3313_v48 }
  0x8e   :  { %902 = vmatpush.bf16.msrb.mxu2 %v3316_v52  ;;  %911 = vmatpush.bf16.msrb.mxu0 %v3319_v57 }
  0x91   :  { %1014 = vmatpush.bf16.msra.mxu3 %v3246_v27  ;;  %889 = vmatpush.bf16.msrb.mxu1 %v3323_v60 }
  0x92   :  { %1037 = vmatpush.bf16.msra.mxu2 %v3248_v28  ;;  %912 = vmatpush.bf16.msrb.mxu0 %v3327_v61 }
  0x95   :  { %1024 = vmatpush.bf16.msra.mxu1 %v3250_v37  ;;  %1015 = vmatpush.bf16.msra.mxu3 %v3254_v40 }
  0x96   :  { %1038 = vmatpush.bf16.msra.mxu2 %v3256_v41  ;;  %913 = vmatpush.bf16.msrb.mxu0 %v3334_v2 }
  0x99   :  { %1025 = vmatpush.bf16.msra.mxu1 %v3259_v49  ;;  %1016 = vmatpush.bf16.msra.mxu3 %v3263_v54 }
  0x9a   :  { %1039 = vmatpush.bf16.msra.mxu2 %v3265_v55  ;;  %914 = vmatpush.bf16.msrb.mxu0 %v3340_v7 }
  0x9d   :  { %1026 = vmatpush.bf16.msra.mxu1 %v3271_v0  ;;  %1017 = vmatpush.bf16.msra.mxu3 %v3275_v3 }
  0x9e   :  { %1040 = vmatpush.bf16.msra.mxu2 %v3277_v4  ;;  %915 = vmatpush.bf16.msrb.mxu0 %v3346_v9 }
  0xa1   :  { %1027 = vmatpush.bf16.msra.mxu1 %v3280_v15  ;;  %1018 = vmatpush.bf16.msra.mxu3 %v3284_v16 }
  0xa2   :  { %1041 = vmatpush.bf16.msra.mxu2 %v3286_v17  ;;  %1050 = vmatpush.bf16.msra.mxu0 %v3288_v20 }
  0xa5   :  { %1028 = vmatpush.bf16.msra.mxu1 %v3291_v25 }
  0xa6   :  { %1042 = vmatpush.bf16.msra.mxu2 %v3295_v26  ;;  %1051 = vmatpush.bf16.msra.mxu0 %v3298_v31 }
  0xa9   :  { %1029 = vmatpush.bf16.msra.mxu1 %v3303_v38 }
  0xaa   :  { %1043 = vmatpush.bf16.msra.mxu2 %v3306_v39  ;;  %1052 = vmatpush.bf16.msra.mxu0 %v3309_v44 }
  0xad   :  { %1030 = vmatpush.bf16.msra.mxu1 %v3313_v48 }
  0xae   :  { %1044 = vmatpush.bf16.msra.mxu2 %v3316_v52  ;;  %1053 = vmatpush.bf16.msra.mxu0 %v3319_v57 }
  0xb1   :  { %1031 = vmatpush.bf16.msra.mxu1 %v3323_v60  ;;  %v452_v14 = vpop.f32.mrf.mxu1 }
  0xb2   :  { %1054 = vmatpush.bf16.msra.mxu0 %v3327_v61 }
  0xb6   :  { %1055 = vmatpush.bf16.msra.mxu0 %v3334_v2 }
  0xb7   :  { %v480_v11 = vpop.f32.mrf.mxu3 }
  0xb9   :  { %v454_v32 = vpop.f32.mrf.mxu1 }
  0xba   :  { %1056 = vmatpush.bf16.msra.mxu0 %v3340_v7 }
  0xbe   :  { %1057 = vmatpush.bf16.msra.mxu0 %v3346_v9 }
  0xbf   :  { %v482_v30 = vpop.f32.mrf.mxu3 }
  0xc0   :  { %v438_v19 = vpop.f32.mrf.mxu0 }
  0xc1   :  { %v439_v21 = vadd.f32 %v438_v19, %v165_v18 }
  0xc3   :  { %v453_v23 = vadd.f32 %v452_v14, %v439_v21 }
  0xc5   :  { %541 = vst [vmem:[#allocation2 + $0x30] sm:$0xff] %v453_v23 }
  0xc6   :  { %v466_v24 = vpop.f32.mrf.mxu2 }
  0xc7   :  { %v467_v29 = vadd.f32 %v466_v24, %v166_v22  ;;  %v508_v46 = vpop.f32.mrf.mxu3 }
  0xc8   :  { %v440_v34 = vpop.f32.mrf.mxu0 }
  0xc9   :  { %v481_v33 = vadd.f32 %v480_v11, %v467_v29  ;;  %v441_v35 = vadd.f32 %v440_v34, %v165_v18 }
  0xcb   :  { %542 = vst [vmem:[#allocation2] sm:$0xff] %v481_v33  ;;  %v455_v36 = vadd.f32 %v454_v32, %v441_v35 }
  0xcc   :  { %v581_v14 = vld [vmem:[#allocation2 + $0x30] sm:$0x3] }
  0xcd   :  { %545 = vst [vmem:[#allocation2 + $0x8] sm:$0xff] %v455_v36 }
  0xce   :  { %v468_v42 = vpop.f32.mrf.mxu2 }
  0xcf   :  { %v469_v45 = vadd.f32 %v468_v42, %v166_v22  ;;  %v510_v62 = vpop.f32.mrf.mxu3 }
  0xd1   :  { %v483_v51 = vadd.f32 %v482_v30, %v469_v45  ;;  %v494_v47 = vpop.f32.mrf.mxu1 }
  0xd2   :  { %v495_v53 = vadd.f32 %v494_v47, %v167_v43  ;;  %v582_v32 = vld [vmem:[#allocation2] sm:$0x3] }
  0xd3   :  { %546 = vst [vmem:[#allocation2 + $0x20] sm:$0xff] %v483_v51 }
  0xd4   :  { %v509_v56 = vadd.f32 %v508_v46, %v495_v53 }
  0xd6   :  { %543 = vst [vmem:[#allocation2 + $0x18] sm:$0xff] %v509_v56  ;;  %v536_v6 = vpop.f32.mrf.mxu2 }
  0xd9   :  { %v496_v58 = vpop.f32.mrf.mxu1 }
  0xda   :  { %v497_v59 = vadd.f32 %v496_v58, %v167_v43 }
  0xdc   :  { %v511_v5 = vadd.f32 %v510_v62, %v497_v59 }
  0xde   :  { %547 = vst [vmem:[#allocation2 + $0x28] sm:$0xff] %v511_v5  ;;  %v538_v22 = vpop.f32.mrf.mxu2 }
  0xe0   :  { %v522_v12 = vpop.f32.mrf.mxu0 }
  0xe1   :  { %v523_v8 = vadd.f32 %v522_v12, %v168_v1  ;;  %v583_v12 = vld [vmem:[#allocation2 + $0x18] sm:$0x3] }
  0xe3   :  { %v537_v11 = vadd.f32 %v536_v6, %v523_v8 }
  0xe5   :  { %544 = vst [vmem:[#allocation2 + $0x10] sm:$0xff] %v537_v11 }
  0xe7   :  { %v754_v18 = vpop.f32.mrf.mxu3 }
  0xe8   :  { %v797_v19 = vadd.f32 %v754_v18, %v581_v14  ;;  %v524_v21 = vpop.f32.mrf.mxu0 }
  0xe9   :  { %v525_v23 = vadd.f32 %v524_v21, %v168_v1 }
  0xea   :  { %v2528_v24 = vmul.f32 -1.442695, %v797_v19 }
  0xeb   :  { %v539_v29 = vadd.f32 %v538_v22, %v525_v23 }
  0xec   :  { %2844 = vpow2.f32 %v2528_v24  ;;  %v584_v59 = vld [vmem:[#allocation2 + $0x10] sm:$0x3] }
  0xed   :  { %548 = vst [vmem:[#allocation2 + $0x38] sm:$0xff] %v539_v29 }
  0xef   :  { %v756_v30 = vpop.f32.mrf.mxu3 }
  0xf1   :  { %v767_v10 = vpop.f32.mrf.mxu1 }
  0xf2   :  { %v798_v33 = vadd.f32 %v767_v10, %v582_v32  ;;  %v2845_v34 = vpop.eup %2844 }
  0xf3   :  { %v804_v35 = vadd.f32 1.0, %v2845_v34 }
  0xf4   :  { %v2529_v36 = vmul.f32 -1.442695, %v798_v33 }
  0xf5   :  { %2846 = vrcp.f32 %v804_v35  ;;  %v816_v21 = vand.u32 2147483648, %v804_v35  ;;  %vm810_vm3 = vweird.f32 %v804_v35  ;;  %v814_v23 = vand.u32 2147483647, %v804_v35 }
  0xf6   :  { %v780_v42 = vpop.f32.mrf.mxu2  ;;  %2848 = vpow2.f32 %v2529_v36 }
  0xf7   :  { %v799_v11 = vadd.f32 %v780_v42, %v583_v12  ;;  %v817_v33 = vor.u32 1.1754944e-38, %v816_v21  ;;  %vm815_vm7 = vcmp.eq.f32.partialorder %v814_v23, 8.507059e+37  ;;  %v865_v23 = vld [vmem:[#allocation2] sm:$0xc] }
  0xf9   :  { %v769_v43 = vpop.f32.mrf.mxu1 }
  0xfb   :  { %v2847_v45 = vpop.eup %2846 }
  0xfc   :  { %v2849_v46 = vpop.eup %2848  ;;  %v806_v47 = vmul.f32 %v2847_v45, %v804_v35  ;;  %vm811_vm2 = vweird.f32 %v2847_v45 }
  0xfd   :  { %v823_v53 = vadd.f32 1.0, %v2849_v46  ;;  %vm812_vm4 = vmor %vm810_vm3, %vm811_vm2 }
  0xfe   :  { %v782_v51 = vpop.f32.mrf.mxu2  ;;  %v807_v58 = vsub.f32 1.0, %v806_v47 }
  0xff   :  { %2850 = vrcp.f32 %v823_v53  ;;  %v835_v22 = vand.u32 2147483648, %v823_v53  ;;  %v833_v30 = vand.u32 2147483647, %v823_v53  ;;  %vm829_vm6 = vweird.f32 %v823_v53 }
 0x100   :  { %v793_v56 = vpop.f32.mrf.mxu0  ;;  %v808_v5 = vmul.f32 %v2847_v45, %v807_v58 }
 0x101   :  { %v800_v62 = vadd.f32 %v793_v56, %v584_v59  ;;  %v836_v36 = vor.u32 1.1754944e-38, %v835_v22  ;;  %vm834_vm9 = vcmp.eq.f32.partialorder %v833_v30, 8.507059e+37  ;;  %v867_v30 = vld [vmem:[#allocation2 + $0x10] sm:$0xc] }
 0x102   :  { %v809_v18 = vadd.f32 %v2847_v45, %v808_v5 }
 0x103   :  { %v2530_v1 = vmul.f32 -1.442695, %v800_v62 }
 0x104   :  { %v813_v32 = vsel %vm812_vm4, %v2847_v45, %v809_v18 }
 0x105   :  { %2852 = vpow2.f32 %v2530_v1  ;;  %v2851_v6 = vpop.eup %2850  ;;  %v818_v42 = vsel %vm815_vm7, %v817_v33, %v813_v32 }
 0x106   :  { %v825_v8 = vmul.f32 %v2851_v6, %v823_v53  ;;  %vm830_vm5 = vweird.f32 %v2851_v6  ;;  %2854 = vtanh.f32 %v799_v11 }
 0x107   :  { %vm831_vm8 = vmor %vm829_vm6, %vm830_vm5 }
 0x108   :  { %v795_v14 = vpop.f32.mrf.mxu0  ;;  %v826_v19 = vsub.f32 1.0, %v825_v8 }
 0x10a   :  { %v827_v29 = vmul.f32 %v2851_v6, %v826_v19 }
 0x10b   :  { %v2853_v24 = vpop.eup %2852 }
 0x10c   :  { %v843_v10 = vadd.f32 1.0, %v2853_v24  ;;  %v828_v34 = vadd.f32 %v2851_v6, %v827_v29  ;;  %v2855_v35 = vpop.eup %2854 }
 0x10d   :  { %v860_v47 = vmul.f32 %v2855_v35, %v818_v42 }
 0x10e   :  { %2856 = vrcp.f32 %v843_v10  ;;  %v832_v43 = vsel %vm831_vm8, %v2851_v6, %v828_v34  ;;  %v855_v53 = vand.u32 2147483648, %v843_v10  ;;  %v853_v1 = vand.u32 2147483647, %v843_v10 }
 0x10f   :  { %v837_v51 = vsel %vm834_vm9, %v836_v36, %v832_v43  ;;  %vm849_vm11 = vweird.f32 %v843_v10  ;;  %v864_v43 = vld [vmem:[#allocation2 + $0x30] sm:$0xc] }
 0x110   :  { %v859_v46 = vmul.f32 0.0, %v837_v51  ;;  %v856_v6 = vor.u32 1.1754944e-38, %v855_v53  ;;  %vm854_vm13 = vcmp.eq.f32.partialorder %v853_v1, 8.507059e+37 }
 0x112   :  { %v3401_v58 = vadd.f32 %v860_v47, %v859_v46 }
 0x114   :  { %v2857_v56 = vpop.eup %2856  ;;  %2858 = vtanh.f32 %v3401_v58 }
 0x115   :  { %v845_v59 = vmul.f32 %v2857_v56, %v843_v10  ;;  %vm850_vm10 = vweird.f32 %v2857_v56 }
 0x116   :  { %vm851_vm12 = vmor %vm849_vm11, %vm850_vm10 }
 0x117   :  { %v846_v45 = vsub.f32 1.0, %v845_v59 }
 0x119   :  { %v847_v62 = vmul.f32 %v2857_v56, %v846_v45 }
 0x11a   :  { %v2859_v8 = vpop.eup %2858 }
 0x11b   :  { %v848_v5 = vadd.f32 %v2857_v56, %v847_v62 }
 0x11d   :  { %v852_v12 = vsel %vm851_vm12, %v2857_v56, %v848_v5 }
 0x11e   :  { %v857_v11 = vsel %vm854_vm13, %v856_v6, %v852_v12 }
 0x11f   :  { %v863_v14 = vmul.f32 %v2859_v8, %v857_v11 }
 0x121   :  { %v868_v18 = vpack.c.bf16 %v863_v14, %v863_v14 }
 0x123   :  { %877 = vmatmul.bf16.vlgmr.msrb.gmra.mxu3 %v868_v18  ;;  %890 = vmatmul.bf16.vlgmr.msrb.gmra.mxu1 %v868_v18 }
 0x124   :  { %903 = vmatmul.bf16.vlgmr.msrb.gmra.mxu2 %v868_v18  ;;  %916 = vmatmul.bf16.vlgmr.msrb.gmra.mxu0 %v868_v18 }
 0x125   :  { %1153 = vmatpush.bf16.msrb.mxu3 %v3231_v50  ;;  %1166 = vmatpush.bf16.msrb.mxu1 %v3250_v37 }
 0x126   :  { %1179 = vmatpush.bf16.msrb.mxu2 %v3248_v28  ;;  %1192 = vmatpush.bf16.msrb.mxu0 %v3288_v20 }
 0x129   :  { %1154 = vmatpush.bf16.msrb.mxu3 %v3237_v63  ;;  %1167 = vmatpush.bf16.msrb.mxu1 %v3259_v49 }
 0x12a   :  { %1180 = vmatpush.bf16.msrb.mxu2 %v3256_v41  ;;  %1193 = vmatpush.bf16.msrb.mxu0 %v3298_v31 }
 0x12d   :  { %1155 = vmatpush.bf16.msrb.mxu3 %v3241_v13  ;;  %1168 = vmatpush.bf16.msrb.mxu1 %v3271_v0 }
 0x12e   :  { %1181 = vmatpush.bf16.msrb.mxu2 %v3265_v55  ;;  %1194 = vmatpush.bf16.msrb.mxu0 %v3309_v44 }
 0x131   :  { %1156 = vmatpush.bf16.msrb.mxu3 %v3246_v27  ;;  %1169 = vmatpush.bf16.msrb.mxu1 %v3280_v15 }
 0x132   :  { %1182 = vmatpush.bf16.msrb.mxu2 %v3277_v4  ;;  %1195 = vmatpush.bf16.msrb.mxu0 %v3319_v57 }
 0x135   :  { %1157 = vmatpush.bf16.msrb.mxu3 %v3254_v40  ;;  %1170 = vmatpush.bf16.msrb.mxu1 %v3291_v25 }
 0x136   :  { %1183 = vmatpush.bf16.msrb.mxu2 %v3286_v17  ;;  %1196 = vmatpush.bf16.msrb.mxu0 %v3327_v61 }
 0x139   :  { %1158 = vmatpush.bf16.msrb.mxu3 %v3263_v54  ;;  %1171 = vmatpush.bf16.msrb.mxu1 %v3303_v38 }
 0x13a   :  { %1184 = vmatpush.bf16.msrb.mxu2 %v3295_v26  ;;  %1197 = vmatpush.bf16.msrb.mxu0 %v3334_v2 }
 0x13d   :  { %1159 = vmatpush.bf16.msrb.mxu3 %v3275_v3  ;;  %1172 = vmatpush.bf16.msrb.mxu1 %v3313_v48 }
 0x13e   :  { %1185 = vmatpush.bf16.msrb.mxu2 %v3306_v39  ;;  %1198 = vmatpush.bf16.msrb.mxu0 %v3340_v7 }
 0x141   :  { %1160 = vmatpush.bf16.msrb.mxu3 %v3284_v16  ;;  %1173 = vmatpush.bf16.msrb.mxu1 %v3323_v60 }
 0x142   :  { %1186 = vmatpush.bf16.msrb.mxu2 %v3316_v52  ;;  %1199 = vmatpush.bf16.msrb.mxu0 %v3346_v9 }
 0x1a0   :  { %v891_v19 = vpop.f32.mrf.mxu1 }
 0x1a1   :  { %v926_v21 = vrot.slane %v891_v19, 6  ;;  %v917_v22 = vpop.f32.mrf.mxu0 }
 0x1a2   :  { %v928_v24 = vrot.slane %v917_v22, 6 }
 0x1a3   :  { %v934_v29 = vadd.f32 %v926_v21, %v865_v23  ;;  %v866_v21 = vld [vmem:[#allocation2 + $0x18] sm:$0xc] }
 0x1a4   :  { %v936_v32 = vadd.f32 %v928_v24, %v867_v30 }
 0x1a5   :  { %v2532_v10 = vmul.f32 -1.442695, %v934_v29 }
 0x1a6   :  { %v2533_v33 = vmul.f32 -1.442695, %v936_v32  ;;  %v878_v34 = vpop.f32.mrf.mxu3 }
 0x1a7   :  { %2860 = vpow2.f32 %v2532_v10  ;;  %v925_v36 = vrot.slane %v878_v34, 6  ;;  %v904_v42 = vpop.f32.mrf.mxu2 }
 0x1a8   :  { %2862 = vpow2.f32 %v2533_v33  ;;  %v893_v51 = vpop.f32.mrf.mxu1  ;;  %v927_v11 = vrot.slane %v904_v42, 6 }
 0x1a9   :  { %v933_v35 = vadd.f32 %v925_v36, %v864_v43  ;;  %v919_v46 = vpop.f32.mrf.mxu0 }
 0x1aa   :  { %v935_v23 = vadd.f32 %v927_v11, %v866_v21 }
 0x1ab   :  { %v2531_v47 = vmul.f32 -1.442695, %v933_v35 }
 0x1ad   :  { %v2861_v56 = vpop.eup %2860  ;;  %2864 = vpow2.f32 %v2531_v47 }
 0x1ae   :  { %v2863_v59 = vpop.eup %2862  ;;  %v959_v45 = vadd.f32 1.0, %v2861_v56  ;;  %v880_v53 = vpop.f32.mrf.mxu3 }
 0x1af   :  { %v906_v62 = vpop.f32.mrf.mxu2  ;;  %v979_v1 = vadd.f32 1.0, %v2863_v59  ;;  %v996_v59 = vrot.slane %v3401_v58, 6 }
 0x1b0   :  { %2866 = vrcp.f32 %v959_v45  ;;  %v971_v30 = vand.u32 2147483648, %v959_v45  ;;  %vm965_vm15 = vweird.f32 %v959_v45  ;;  %v969_v33 = vand.u32 2147483647, %v959_v45 }
 0x1b1   :  { %2868 = vrcp.f32 %v979_v1  ;;  %vm985_vm8 = vweird.f32 %v979_v1 }
 0x1b2   :  { %v972_v51 = vor.u32 1.1754944e-38, %v971_v30  ;;  %vm970_vm4 = vcmp.eq.f32.partialorder %v969_v33, 8.507059e+37 }
 0x1b3   :  { %v2865_v5 = vpop.eup %2864 }
 0x1b4   :  { %v940_v6 = vadd.f32 1.0, %v2865_v5 }
 0x1b6   :  { %v2867_v12 = vpop.eup %2866  ;;  %2870 = vrcp.f32 %v940_v6  ;;  %v952_v34 = vand.u32 2147483648, %v940_v6  ;;  %v950_v42 = vand.u32 2147483647, %v940_v6  ;;  %vm946_vm3 = vweird.f32 %v940_v6 }
 0x1b7   :  { %v961_v8 = vmul.f32 %v2867_v12, %v959_v45  ;;  %v2869_v18 = vpop.eup %2868  ;;  %vm966_vm14 = vweird.f32 %v2867_v12  ;;  %2872 = vtanh.f32 %v935_v23 }
 0x1b8   :  { %v981_v32 = vmul.f32 %v2869_v18, %v979_v1  ;;  %vm967_vm1 = vmor %vm965_vm15, %vm966_vm14  ;;  %v953_v47 = vor.u32 1.1754944e-38, %v952_v34  ;;  %vm951_vm6 = vcmp.eq.f32.partialorder %v950_v42, 8.507059e+37  ;;  %vm986_vm7 = vweird.f32 %v2869_v18 }
 0x1b9   :  { %v962_v14 = vsub.f32 1.0, %v961_v8  ;;  %vm987_vm9 = vmor %vm985_vm8, %vm986_vm7 }
 0x1ba   :  { %v982_v35 = vsub.f32 1.0, %v981_v32 }
 0x1bb   :  { %v963_v19 = vmul.f32 %v2867_v12, %v962_v14 }
 0x1bc   :  { %v2871_v22 = vpop.eup %2870  ;;  %v983_v5 = vmul.f32 %v2869_v18, %v982_v35 }
 0x1bd   :  { %v942_v24 = vmul.f32 %v2871_v22, %v940_v6  ;;  %v964_v29 = vadd.f32 %v2867_v12, %v963_v19  ;;  %vm947_vm2 = vweird.f32 %v2871_v22  ;;  %v2873_v45 = vpop.eup %2872  ;;  %v991_v6 = vand.u32 2147483648, %v979_v1 }
 0x1be   :  { %vm948_vm5 = vmor %vm946_vm3, %vm947_vm2  ;;  %v989_v19 = vand.u32 2147483647, %v979_v1 }
 0x1bf   :  { %v943_v10 = vsub.f32 1.0, %v942_v24  ;;  %v968_v43 = vsel %vm967_vm1, %v2867_v12, %v964_v29  ;;  %v984_v12 = vadd.f32 %v2869_v18, %v983_v5  ;;  %v992_v23 = vor.u32 1.1754944e-38, %v991_v6 }
 0x1c0   :  { %v973_v56 = vsel %vm970_vm4, %v972_v51, %v968_v43  ;;  %vm990_vm10 = vcmp.eq.f32.partialorder %v989_v19, 8.507059e+37 }
 0x1c1   :  { %v944_v36 = vmul.f32 %v2871_v22, %v943_v10  ;;  %v998_v8 = vmul.f32 %v996_v59, %v973_v56  ;;  %v988_v21 = vsel %vm987_vm9, %v2869_v18, %v984_v12  ;;  %v1004_v10 = vld [vmem:[#allocation2] sm:$0x30]  ;;  %v1003_v56 = vld [vmem:[#allocation2 + $0x30] sm:$0x30] }
 0x1c3   :  { %v945_v46 = vadd.f32 %v2871_v22, %v944_v36  ;;  %v1006_v36 = vld [vmem:[#allocation2 + $0x10] sm:$0x30] }
 0x1c5   :  { %v949_v53 = vsel %vm948_vm5, %v2871_v22, %v945_v46  ;;  %v993_v22 = vsel %vm990_vm10, %v992_v23, %v988_v21 }
 0x1c6   :  { %v954_v62 = vsel %vm951_vm6, %v953_v47, %v949_v53 }
 0x1c7   :  { %v999_v11 = vmul.f32 %v2873_v45, %v954_v62 }
 0x1c9   :  { %v3437_v14 = vadd.f32 %v999_v11, %v998_v8 }
 0x1cb   :  { %2874 = vtanh.f32 %v3437_v14 }
 0x1d1   :  { %v2875_v58 = vpop.eup %2874 }
 0x1d2   :  { %v1002_v24 = vmul.f32 %v2875_v58, %v993_v22 }
 0x1d4   :  { %v1007_v29 = vpack.c.bf16 %v1002_v24, %v1002_v24 }
 0x1d6   :  { %v1009_v30 = vrot.slane %v1007_v29, 1 }
 0x1d8   :  { %1019 = vmatmul.bf16.vlgmr.msra.gmra.mxu3 %v1009_v30  ;;  %1032 = vmatmul.bf16.vlgmr.msra.gmra.mxu1 %v1009_v30 }
 0x1d9   :  { %1045 = vmatmul.bf16.vlgmr.msra.gmra.mxu2 %v1009_v30  ;;  %1058 = vmatmul.bf16.vlgmr.msra.gmra.mxu0 %v1009_v30 }
 0x1da   :  { %1295 = vmatpush.bf16.msra.mxu3 %v3231_v50  ;;  %1308 = vmatpush.bf16.msra.mxu1 %v3250_v37 }
 0x1db   :  { %1321 = vmatpush.bf16.msra.mxu2 %v3248_v28  ;;  %1334 = vmatpush.bf16.msra.mxu0 %v3288_v20 }
 0x1de   :  { %1296 = vmatpush.bf16.msra.mxu3 %v3237_v63  ;;  %1309 = vmatpush.bf16.msra.mxu1 %v3259_v49 }
 0x1df   :  { %1322 = vmatpush.bf16.msra.mxu2 %v3256_v41  ;;  %1335 = vmatpush.bf16.msra.mxu0 %v3298_v31 }
 0x1e2   :  { %1297 = vmatpush.bf16.msra.mxu3 %v3241_v13  ;;  %1310 = vmatpush.bf16.msra.mxu1 %v3271_v0 }
 0x1e3   :  { %1323 = vmatpush.bf16.msra.mxu2 %v3265_v55  ;;  %1336 = vmatpush.bf16.msra.mxu0 %v3309_v44 }
 0x1e6   :  { %1298 = vmatpush.bf16.msra.mxu3 %v3246_v27  ;;  %1311 = vmatpush.bf16.msra.mxu1 %v3280_v15 }
 0x1e7   :  { %1324 = vmatpush.bf16.msra.mxu2 %v3277_v4  ;;  %1337 = vmatpush.bf16.msra.mxu0 %v3319_v57 }
 0x1ea   :  { %1299 = vmatpush.bf16.msra.mxu3 %v3254_v40  ;;  %1312 = vmatpush.bf16.msra.mxu1 %v3291_v25 }
 0x1eb   :  { %1325 = vmatpush.bf16.msra.mxu2 %v3286_v17  ;;  %1338 = vmatpush.bf16.msra.mxu0 %v3327_v61 }
 0x1ee   :  { %1300 = vmatpush.bf16.msra.mxu3 %v3263_v54  ;;  %1313 = vmatpush.bf16.msra.mxu1 %v3303_v38 }
 0x1ef   :  { %1326 = vmatpush.bf16.msra.mxu2 %v3295_v26  ;;  %1339 = vmatpush.bf16.msra.mxu0 %v3334_v2 }
 0x1f2   :  { %1301 = vmatpush.bf16.msra.mxu3 %v3275_v3  ;;  %1314 = vmatpush.bf16.msra.mxu1 %v3313_v48 }
 0x1f3   :  { %1327 = vmatpush.bf16.msra.mxu2 %v3306_v39  ;;  %1340 = vmatpush.bf16.msra.mxu0 %v3340_v7 }
 0x1f6   :  { %1302 = vmatpush.bf16.msra.mxu3 %v3284_v16  ;;  %1315 = vmatpush.bf16.msra.mxu1 %v3323_v60 }
 0x1f7   :  { %1328 = vmatpush.bf16.msra.mxu2 %v3316_v52  ;;  %1341 = vmatpush.bf16.msra.mxu0 %v3346_v9 }
 0x255   :  { %v1033_v1 = vpop.f32.mrf.mxu1 }
 0x256   :  { %v1068_v18 = vrot.slane %v1033_v1, 4  ;;  %v1059_v32 = vpop.f32.mrf.mxu0 }
 0x257   :  { %v1070_v33 = vrot.slane %v1059_v32, 4 }
 0x258   :  { %v1076_v34 = vadd.f32 %v1068_v18, %v1004_v10  ;;  %v1005_v18 = vld [vmem:[#allocation2 + $0x18] sm:$0x30] }
 0x259   :  { %v1078_v42 = vadd.f32 %v1070_v33, %v1006_v36 }
 0x25a   :  { %v2535_v43 = vmul.f32 -1.442695, %v1076_v34 }
 0x25b   :  { %v2536_v51 = vmul.f32 -1.442695, %v1078_v42  ;;  %v1020_v35 = vpop.f32.mrf.mxu3 }
 0x25c   :  { %2876 = vpow2.f32 %v2535_v43  ;;  %v1067_v46 = vrot.slane %v1020_v35, 4  ;;  %v1046_v47 = vpop.f32.mrf.mxu2 }
 0x25d   :  { %2878 = vpow2.f32 %v2536_v51  ;;  %v1035_v59 = vpop.f32.mrf.mxu1  ;;  %v1069_v24 = vrot.slane %v1046_v47, 4 }
 0x25e   :  { %v1075_v53 = vadd.f32 %v1067_v46, %v1003_v56  ;;  %v1061_v45 = vpop.f32.mrf.mxu0 }
 0x25f   :  { %v1077_v10 = vadd.f32 %v1069_v24, %v1005_v18 }
 0x260   :  { %v2534_v62 = vmul.f32 -1.442695, %v1075_v53 }
 0x262   :  { %v2877_v5 = vpop.eup %2876  ;;  %2880 = vpow2.f32 %v2534_v62 }
 0x263   :  { %v2879_v8 = vpop.eup %2878  ;;  %v1101_v11 = vadd.f32 1.0, %v2877_v5  ;;  %v1022_v12 = vpop.f32.mrf.mxu3 }
 0x264   :  { %v1048_v6 = vpop.f32.mrf.mxu2  ;;  %v1121_v19 = vadd.f32 1.0, %v2879_v8  ;;  %v1138_v8 = vrot.slane %v3437_v14, 6 }
 0x265   :  { %2882 = vrcp.f32 %v1101_v11  ;;  %v1113_v36 = vand.u32 2147483648, %v1101_v11  ;;  %vm1107_vm12 = vweird.f32 %v1101_v11  ;;  %v1111_v51 = vand.u32 2147483647, %v1101_v11 }
 0x266   :  { %2884 = vrcp.f32 %v1121_v19  ;;  %vm1127_vm5 = vweird.f32 %v1121_v19 }
 0x267   :  { %v1114_v59 = vor.u32 1.1754944e-38, %v1113_v36  ;;  %vm1112_vm1 = vcmp.eq.f32.partialorder %v1111_v51, 8.507059e+37 }
 0x268   :  { %v2881_v21 = vpop.eup %2880 }
 0x269   :  { %v1082_v23 = vadd.f32 1.0, %v2881_v21 }
 0x26b   :  { %v2883_v58 = vpop.eup %2882  ;;  %2886 = vrcp.f32 %v1082_v23  ;;  %v1094_v35 = vand.u32 2147483648, %v1082_v23  ;;  %v1092_v47 = vand.u32 2147483647, %v1082_v23  ;;  %vm1088_vm15 = vweird.f32 %v1082_v23 }
 0x26c   :  { %v1103_v22 = vmul.f32 %v2883_v58, %v1101_v11  ;;  %v2885_v30 = vpop.eup %2884  ;;  %vm1108_vm11 = vweird.f32 %v2883_v58  ;;  %2888 = vtanh.f32 %v1077_v10 }
 0x26d   :  { %v1123_v42 = vmul.f32 %v2885_v30, %v1121_v19  ;;  %vm1109_vm13 = vmor %vm1107_vm12, %vm1108_vm11  ;;  %v1095_v62 = vor.u32 1.1754944e-38, %v1094_v35  ;;  %vm1093_vm3 = vcmp.eq.f32.partialorder %v1092_v47, 8.507059e+37  ;;  %vm1128_vm4 = vweird.f32 %v2885_v30 }
 0x26e   :  { %v1104_v29 = vsub.f32 1.0, %v1103_v22  ;;  %vm1129_vm6 = vmor %vm1127_vm5, %vm1128_vm4 }
 0x26f   :  { %v1124_v53 = vsub.f32 1.0, %v1123_v42 }
 0x270   :  { %v1105_v1 = vmul.f32 %v2883_v58, %v1104_v29 }
 0x271   :  { %v2887_v32 = vpop.eup %2886  ;;  %v1125_v21 = vmul.f32 %v2885_v30, %v1124_v53 }
 0x272   :  { %v1084_v33 = vmul.f32 %v2887_v32, %v1082_v23  ;;  %v1106_v34 = vadd.f32 %v2883_v58, %v1105_v1  ;;  %vm1089_vm14 = vweird.f32 %v2887_v32  ;;  %v2889_v11 = vpop.eup %2888  ;;  %v1133_v23 = vand.u32 2147483648, %v1121_v19 }
 0x273   :  { %vm1090_vm2 = vmor %vm1088_vm15, %vm1089_vm14  ;;  %v1131_v1 = vand.u32 2147483647, %v1121_v19 }
 0x274   :  { %v1085_v43 = vsub.f32 1.0, %v1084_v33  ;;  %v1110_v56 = vsel %vm1109_vm13, %v2883_v58, %v1106_v34  ;;  %v1126_v58 = vadd.f32 %v2885_v30, %v1125_v21  ;;  %v1134_v10 = vor.u32 1.1754944e-38, %v1133_v23 }
 0x275   :  { %v1115_v5 = vsel %vm1112_vm1, %v1114_v59, %v1110_v56  ;;  %vm1132_vm7 = vcmp.eq.f32.partialorder %v1131_v1, 8.507059e+37 }
 0x276   :  { %v1086_v46 = vmul.f32 %v2887_v32, %v1085_v43  ;;  %v1140_v22 = vmul.f32 %v1138_v8, %v1115_v5  ;;  %v1130_v18 = vsel %vm1129_vm6, %v2885_v30, %v1126_v58  ;;  %v1146_v43 = vld [vmem:[#allocation2] sm:$0xc0]  ;;  %v1145_v5 = vld [vmem:[#allocation2 + $0x30] sm:$0xc0] }
 0x278   :  { %v1087_v45 = vadd.f32 %v2887_v32, %v1086_v46  ;;  %v1148_v46 = vld [vmem:[#allocation2 + $0x10] sm:$0xc0] }
 0x27a   :  { %v1091_v12 = vsel %vm1090_vm2, %v2887_v32, %v1087_v45  ;;  %v1135_v32 = vsel %vm1132_vm7, %v1134_v10, %v1130_v18 }
 0x27b   :  { %v1096_v6 = vsel %vm1093_vm3, %v1095_v62, %v1091_v12 }
 0x27c   :  { %v1141_v24 = vmul.f32 %v2889_v11, %v1096_v6 }
 0x27e   :  { %v3473_v29 = vadd.f32 %v1141_v24, %v1140_v22 }
 0x280   :  { %2890 = vtanh.f32 %v3473_v29 }
 0x286   :  { %v2891_v14 = vpop.eup %2890 }
 0x287   :  { %v1144_v33 = vmul.f32 %v2891_v14, %v1135_v32 }
 0x289   :  { %v1149_v34 = vpack.c.bf16 %v1144_v33, %v1144_v33 }
 0x28b   :  { %v1151_v36 = vrot.slane %v1149_v34, 2 }
 0x28d   :  { %1161 = vmatmul.bf16.vlgmr.msrb.gmra.mxu3 %v1151_v36  ;;  %1174 = vmatmul.bf16.vlgmr.msrb.gmra.mxu1 %v1151_v36 }
 0x28e   :  { %1187 = vmatmul.bf16.vlgmr.msrb.gmra.mxu2 %v1151_v36  ;;  %1200 = vmatmul.bf16.vlgmr.msrb.gmra.mxu0 %v1151_v36 }
 0x28f   :  { %1422 = vmatpush.bf16.msrb.mxu3 %v3231_v50  ;;  %1435 = vmatpush.bf16.msrb.mxu1 %v3250_v37 }
 0x290   :  { %1448 = vmatpush.bf16.msrb.mxu2 %v3248_v28  ;;  %1461 = vmatpush.bf16.msrb.mxu0 %v3288_v20 }
 0x293   :  { %1423 = vmatpush.bf16.msrb.mxu3 %v3237_v63  ;;  %1436 = vmatpush.bf16.msrb.mxu1 %v3259_v49 }
 0x294   :  { %1449 = vmatpush.bf16.msrb.mxu2 %v3256_v41  ;;  %1462 = vmatpush.bf16.msrb.mxu0 %v3298_v31 }
 0x297   :  { %1424 = vmatpush.bf16.msrb.mxu3 %v3241_v13  ;;  %1437 = vmatpush.bf16.msrb.mxu1 %v3271_v0 }
 0x298   :  { %1450 = vmatpush.bf16.msrb.mxu2 %v3265_v55  ;;  %1463 = vmatpush.bf16.msrb.mxu0 %v3309_v44 }
 0x29b   :  { %1425 = vmatpush.bf16.msrb.mxu3 %v3246_v27  ;;  %1438 = vmatpush.bf16.msrb.mxu1 %v3280_v15 }
 0x29c   :  { %1451 = vmatpush.bf16.msrb.mxu2 %v3277_v4  ;;  %1464 = vmatpush.bf16.msrb.mxu0 %v3319_v57 }
 0x29f   :  { %1426 = vmatpush.bf16.msrb.mxu3 %v3254_v40  ;;  %1439 = vmatpush.bf16.msrb.mxu1 %v3291_v25 }
 0x2a0   :  { %1452 = vmatpush.bf16.msrb.mxu2 %v3286_v17  ;;  %1465 = vmatpush.bf16.msrb.mxu0 %v3327_v61 }
 0x2a3   :  { %1427 = vmatpush.bf16.msrb.mxu3 %v3263_v54  ;;  %1440 = vmatpush.bf16.msrb.mxu1 %v3303_v38 }
 0x2a4   :  { %1453 = vmatpush.bf16.msrb.mxu2 %v3295_v26  ;;  %1466 = vmatpush.bf16.msrb.mxu0 %v3334_v2 }
 0x2a7   :  { %1428 = vmatpush.bf16.msrb.mxu3 %v3275_v3  ;;  %1441 = vmatpush.bf16.msrb.mxu1 %v3313_v48 }
 0x2a8   :  { %1454 = vmatpush.bf16.msrb.mxu2 %v3306_v39  ;;  %1467 = vmatpush.bf16.msrb.mxu0 %v3340_v7 }
 0x2ab   :  { %1429 = vmatpush.bf16.msrb.mxu3 %v3284_v16  ;;  %1442 = vmatpush.bf16.msrb.mxu1 %v3323_v60 }
 0x2ac   :  { %1455 = vmatpush.bf16.msrb.mxu2 %v3316_v52  ;;  %1468 = vmatpush.bf16.msrb.mxu0 %v3346_v9 }
 0x30a   :  { %v1175_v19 = vpop.f32.mrf.mxu1 }
 0x30b   :  { %v1210_v30 = vrot.slane %v1175_v19, 2  ;;  %v1201_v42 = vpop.f32.mrf.mxu0 }
 0x30c   :  { %v1212_v51 = vrot.slane %v1201_v42, 2 }
 0x30d   :  { %v1218_v35 = vadd.f32 %v1210_v30, %v1146_v43  ;;  %v1147_v30 = vld [vmem:[#allocation2 + $0x18] sm:$0xc0] }
 0x30e   :  { %v1220_v47 = vadd.f32 %v1212_v51, %v1148_v46 }
 0x30f   :  { %v2538_v56 = vmul.f32 -1.442695, %v1218_v35 }
 0x310   :  { %v2539_v59 = vmul.f32 -1.442695, %v1220_v47  ;;  %v1162_v53 = vpop.f32.mrf.mxu3 }
 0x311   :  { %2892 = vpow2.f32 %v2538_v56  ;;  %v1209_v45 = vrot.slane %v1162_v53, 2  ;;  %v1188_v62 = vpop.f32.mrf.mxu2 }
 0x312   :  { %2894 = vpow2.f32 %v2539_v59  ;;  %v1177_v8 = vpop.f32.mrf.mxu1  ;;  %v1211_v33 = vrot.slane %v1188_v62, 2 }
 0x313   :  { %v1217_v12 = vadd.f32 %v1209_v45, %v1145_v5  ;;  %v1203_v11 = vpop.f32.mrf.mxu0 }
 0x314   :  { %v1219_v43 = vadd.f32 %v1211_v33, %v1147_v30 }
 0x315   :  { %v2537_v6 = vmul.f32 -1.442695, %v1217_v12 }
 0x317   :  { %v2893_v21 = vpop.eup %2892  ;;  %2896 = vpow2.f32 %v2537_v6 }
 0x318   :  { %v2895_v22 = vpop.eup %2894  ;;  %v1243_v24 = vadd.f32 1.0, %v2893_v21  ;;  %v1164_v58 = vpop.f32.mrf.mxu3 }
 0x319   :  { %v1190_v23 = vpop.f32.mrf.mxu2  ;;  %v1263_v1 = vadd.f32 1.0, %v2895_v22  ;;  %v1280_v22 = vrot.slane %v3473_v29, 6 }
 0x31a   :  { %2898 = vrcp.f32 %v1243_v24  ;;  %v1255_v46 = vand.u32 2147483648, %v1243_v24  ;;  %vm1249_vm9 = vweird.f32 %v1243_v24  ;;  %v1253_v59 = vand.u32 2147483647, %v1243_v24 }
 0x31b   :  { %2900 = vrcp.f32 %v1263_v1  ;;  %vm1269_vm2 = vweird.f32 %v1263_v1 }
 0x31c   :  { %v1256_v8 = vor.u32 1.1754944e-38, %v1255_v46  ;;  %vm1254_vm13 = vcmp.eq.f32.partialorder %v1253_v59, 8.507059e+37 }
 0x31d   :  { %v2897_v18 = vpop.eup %2896 }
 0x31e   :  { %v1224_v10 = vadd.f32 1.0, %v2897_v18 }
 0x320   :  { %v2899_v14 = vpop.eup %2898  ;;  %2902 = vrcp.f32 %v1224_v10  ;;  %v1236_v53 = vand.u32 2147483648, %v1224_v10  ;;  %v1234_v62 = vand.u32 2147483647, %v1224_v10  ;;  %vm1230_vm12 = vweird.f32 %v1224_v10 }
 0x321   :  { %v1245_v32 = vmul.f32 %v2899_v14, %v1243_v24  ;;  %v2901_v36 = vpop.eup %2900  ;;  %vm1250_vm8 = vweird.f32 %v2899_v14  ;;  %2904 = vtanh.f32 %v1219_v43 }
 0x322   :  { %v1265_v47 = vmul.f32 %v2901_v36, %v1263_v1  ;;  %vm1251_vm10 = vmor %vm1249_vm9, %vm1250_vm8  ;;  %v1237_v6 = vor.u32 1.1754944e-38, %v1236_v53  ;;  %vm1235_vm15 = vcmp.eq.f32.partialorder %v1234_v62, 8.507059e+37  ;;  %vm1270_vm1 = vweird.f32 %v2901_v36 }
 0x323   :  { %v1246_v34 = vsub.f32 1.0, %v1245_v32  ;;  %vm1271_vm3 = vmor %vm1269_vm2, %vm1270_vm1 }
 0x324   :  { %v1266_v12 = vsub.f32 1.0, %v1265_v47 }
 0x325   :  { %v1247_v19 = vmul.f32 %v2899_v14, %v1246_v34 }
 0x326   :  { %v2903_v42 = vpop.eup %2902  ;;  %v1267_v18 = vmul.f32 %v2901_v36, %v1266_v12 }
 0x327   :  { %v1226_v51 = vmul.f32 %v2903_v42, %v1224_v10  ;;  %v1248_v35 = vadd.f32 %v2899_v14, %v1247_v19  ;;  %vm1231_vm11 = vweird.f32 %v2903_v42  ;;  %v2905_v24 = vpop.eup %2904  ;;  %v1275_v10 = vand.u32 2147483648, %v1263_v1 }
 0x328   :  { %vm1232_vm14 = vmor %vm1230_vm12, %vm1231_vm11  ;;  %v1273_v19 = vand.u32 2147483647, %v1263_v1  ;;  %v1288_v1 = vld [vmem:[#allocation2 + $0x20] sm:$0x3] }
 0x329   :  { %v1227_v56 = vsub.f32 1.0, %v1226_v51  ;;  %v1252_v5 = vsel %vm1251_vm10, %v2899_v14, %v1248_v35  ;;  %v1268_v14 = vadd.f32 %v2901_v36, %v1267_v18  ;;  %v1276_v43 = vor.u32 1.1754944e-38, %v1275_v10 }
 0x32a   :  { %v1257_v21 = vsel %vm1254_vm13, %v1256_v8, %v1252_v5  ;;  %vm1274_vm4 = vcmp.eq.f32.partialorder %v1273_v19, 8.507059e+37  ;;  %v1287_v5 = vld [vmem:[#allocation2 + $0x8] sm:$0x3] }
 0x32b   :  { %v1228_v45 = vmul.f32 %v2903_v42, %v1227_v56  ;;  %v1282_v32 = vmul.f32 %v1280_v22, %v1257_v21  ;;  %v1272_v30 = vsel %vm1271_vm3, %v2901_v36, %v1268_v14  ;;  %v1290_v56 = vld [vmem:[#allocation2 + $0x38] sm:$0x3] }
 0x32d   :  { %v1229_v11 = vadd.f32 %v2903_v42, %v1228_v45 }
 0x32f   :  { %v1233_v58 = vsel %vm1232_vm14, %v2903_v42, %v1229_v11  ;;  %v1277_v42 = vsel %vm1274_vm4, %v1276_v43, %v1272_v30 }
 0x330   :  { %v1238_v23 = vsel %vm1235_vm15, %v1237_v6, %v1233_v58 }
 0x331   :  { %v1283_v33 = vmul.f32 %v2905_v24, %v1238_v23 }
 0x333   :  { %v3509_v34 = vadd.f32 %v1283_v33, %v1282_v32 }
 0x335   :  { %2906 = vtanh.f32 %v3509_v34 }
 0x33b   :  { %v2907_v29 = vpop.eup %2906 }
 0x33c   :  { %v1286_v51 = vmul.f32 %v2907_v29, %v1277_v42 }
 0x33e   :  { %v1291_v35 = vpack.c.bf16 %v1286_v51, %v1286_v51  ;;  %v1289_v51 = vld [vmem:[#allocation2 + $0x28] sm:$0x3] }
 0x340   :  { %v1293_v46 = vrot.slane %v1291_v35, 3 }
 0x342   :  { %1303 = vmatmul.bf16.vlgmr.msra.gmra.mxu3 %v1293_v46  ;;  %1316 = vmatmul.bf16.vlgmr.msra.gmra.mxu1 %v1293_v46 }
 0x343   :  { %1329 = vmatmul.bf16.vlgmr.msra.gmra.mxu2 %v1293_v46  ;;  %1342 = vmatmul.bf16.vlgmr.msra.gmra.mxu0 %v1293_v46 }
 0x344   :  { %1564 = vmatpush.bf16.msra.mxu3 %v3231_v50  ;;  %1577 = vmatpush.bf16.msra.mxu1 %v3250_v37 }
 0x345   :  { %1590 = vmatpush.bf16.msra.mxu2 %v3248_v28  ;;  %1603 = vmatpush.bf16.msra.mxu0 %v3288_v20 }
 0x348   :  { %1565 = vmatpush.bf16.msra.mxu3 %v3237_v63  ;;  %1578 = vmatpush.bf16.msra.mxu1 %v3259_v49 }
 0x349   :  { %1591 = vmatpush.bf16.msra.mxu2 %v3256_v41  ;;  %1604 = vmatpush.bf16.msra.mxu0 %v3298_v31 }
 0x34c   :  { %1566 = vmatpush.bf16.msra.mxu3 %v3241_v13  ;;  %1579 = vmatpush.bf16.msra.mxu1 %v3271_v0 }
 0x34d   :  { %1592 = vmatpush.bf16.msra.mxu2 %v3265_v55  ;;  %1605 = vmatpush.bf16.msra.mxu0 %v3309_v44 }
 0x350   :  { %1567 = vmatpush.bf16.msra.mxu3 %v3246_v27  ;;  %1580 = vmatpush.bf16.msra.mxu1 %v3280_v15 }
 0x351   :  { %1593 = vmatpush.bf16.msra.mxu2 %v3277_v4  ;;  %1606 = vmatpush.bf16.msra.mxu0 %v3319_v57 }
 0x354   :  { %1568 = vmatpush.bf16.msra.mxu3 %v3254_v40  ;;  %1581 = vmatpush.bf16.msra.mxu1 %v3291_v25 }
 0x355   :  { %1594 = vmatpush.bf16.msra.mxu2 %v3286_v17  ;;  %1607 = vmatpush.bf16.msra.mxu0 %v3327_v61 }
 0x358   :  { %1569 = vmatpush.bf16.msra.mxu3 %v3263_v54  ;;  %1582 = vmatpush.bf16.msra.mxu1 %v3303_v38 }
 0x359   :  { %1595 = vmatpush.bf16.msra.mxu2 %v3295_v26  ;;  %1608 = vmatpush.bf16.msra.mxu0 %v3334_v2 }
 0x35c   :  { %1570 = vmatpush.bf16.msra.mxu3 %v3275_v3  ;;  %1583 = vmatpush.bf16.msra.mxu1 %v3313_v48 }
 0x35d   :  { %1596 = vmatpush.bf16.msra.mxu2 %v3306_v39  ;;  %1609 = vmatpush.bf16.msra.mxu0 %v3340_v7 }
 0x360   :  { %1571 = vmatpush.bf16.msra.mxu3 %v3284_v16  ;;  %1584 = vmatpush.bf16.msra.mxu1 %v3323_v60 }
 0x361   :  { %1597 = vmatpush.bf16.msra.mxu2 %v3316_v52  ;;  %1610 = vmatpush.bf16.msra.mxu0 %v3346_v9 }
 0x3bf   :  { %v1317_v36 = vpop.f32.mrf.mxu1 }
 0x3c0   :  { %v1348_v47 = vadd.f32 %v1317_v36, %v1288_v1  ;;  %v1343_v59 = vpop.f32.mrf.mxu0 }
 0x3c1   :  { %v1350_v53 = vadd.f32 %v1343_v59, %v1290_v56 }
 0x3c2   :  { %v2541_v45 = vmul.f32 -1.442695, %v1348_v47 }
 0x3c3   :  { %v2542_v62 = vmul.f32 -1.442695, %v1350_v53 }
 0x3c4   :  { %2908 = vpow2.f32 %v2541_v45 }
 0x3c5   :  { %2910 = vpow2.f32 %v2542_v62  ;;  %v1304_v8 = vpop.f32.mrf.mxu3 }
 0x3c6   :  { %v1347_v12 = vadd.f32 %v1304_v8, %v1287_v5  ;;  %v1330_v11 = vpop.f32.mrf.mxu2 }
 0x3c7   :  { %v1319_v6 = vpop.f32.mrf.mxu1  ;;  %v1349_v46 = vadd.f32 %v1330_v11, %v1289_v51 }
 0x3c8   :  { %v2540_v21 = vmul.f32 -1.442695, %v1347_v12  ;;  %v1345_v22 = vpop.f32.mrf.mxu0 }
 0x3ca   :  { %v2909_v58 = vpop.eup %2908  ;;  %2912 = vpow2.f32 %v2540_v21 }
 0x3cb   :  { %v2911_v24 = vpop.eup %2910  ;;  %v1373_v23 = vadd.f32 1.0, %v2909_v58 }
 0x3cc   :  { %v1393_v32 = vadd.f32 1.0, %v2911_v24  ;;  %v1410_v24 = vrot.slane %v3509_v34, 6 }
 0x3cd   :  { %2914 = vrcp.f32 %v1373_v23  ;;  %v1306_v18 = vpop.f32.mrf.mxu3  ;;  %v1385_v47 = vand.u32 2147483648, %v1373_v23  ;;  %vm1379_vm6 = vweird.f32 %v1373_v23  ;;  %v1383_v53 = vand.u32 2147483647, %v1373_v23 }
 0x3ce   :  { %v1332_v33 = vpop.f32.mrf.mxu2  ;;  %2916 = vrcp.f32 %v1393_v32  ;;  %vm1399_vm14 = vweird.f32 %v1393_v32 }
 0x3cf   :  { %v1386_v12 = vor.u32 1.1754944e-38, %v1385_v47  ;;  %vm1384_vm10 = vcmp.eq.f32.partialorder %v1383_v53, 8.507059e+37 }
 0x3d0   :  { %v2913_v14 = vpop.eup %2912 }
 0x3d1   :  { %v1354_v10 = vadd.f32 1.0, %v2913_v14 }
 0x3d3   :  { %v2915_v19 = vpop.eup %2914  ;;  %2918 = vrcp.f32 %v1354_v10  ;;  %v1366_v45 = vand.u32 2147483648, %v1354_v10  ;;  %v1364_v5 = vand.u32 2147483647, %v1354_v10  ;;  %vm1360_vm9 = vweird.f32 %v1354_v10 }
 0x3d4   :  { %v1375_v30 = vmul.f32 %v2915_v19, %v1373_v23  ;;  %v2917_v29 = vpop.eup %2916  ;;  %vm1380_vm5 = vweird.f32 %v2915_v19  ;;  %2920 = vtanh.f32 %v1349_v46 }
 0x3d5   :  { %v1395_v56 = vmul.f32 %v2917_v29, %v1393_v32  ;;  %vm1381_vm7 = vmor %vm1379_vm6, %vm1380_vm5  ;;  %v1367_v11 = vor.u32 1.1754944e-38, %v1366_v45  ;;  %vm1365_vm12 = vcmp.eq.f32.partialorder %v1364_v5, 8.507059e+37  ;;  %vm1400_vm13 = vweird.f32 %v2917_v29 }
 0x3d6   :  { %v1376_v43 = vsub.f32 1.0, %v1375_v30  ;;  %vm1401_vm15 = vmor %vm1399_vm14, %vm1400_vm13 }
 0x3d7   :  { %v1396_v6 = vsub.f32 1.0, %v1395_v56 }
 0x3d8   :  { %v1377_v42 = vmul.f32 %v2915_v19, %v1376_v43 }
 0x3d9   :  { %v2919_v35 = vpop.eup %2918  ;;  %v1397_v33 = vmul.f32 %v2917_v29, %v1396_v6 }
 0x3da   :  { %v1356_v1 = vmul.f32 %v2919_v35, %v1354_v10  ;;  %v1378_v36 = vadd.f32 %v2915_v19, %v1377_v42  ;;  %vm1361_vm8 = vweird.f32 %v2919_v35  ;;  %v2921_v23 = vpop.eup %2920  ;;  %v1405_v10 = vand.u32 2147483648, %v1393_v32 }
 0x3db   :  { %vm1362_vm11 = vmor %vm1360_vm9, %vm1361_vm8  ;;  %v1403_v42 = vand.u32 2147483647, %v1393_v32  ;;  %v1419_v32 = vld [vmem:[#allocation2 + $0x28] sm:$0xc] }
 0x3dc   :  { %v1357_v59 = vsub.f32 1.0, %v1356_v1  ;;  %v1382_v8 = vsel %vm1381_vm7, %v2915_v19, %v1378_v36  ;;  %v1398_v19 = vadd.f32 %v2917_v29, %v1397_v33 }
 0x3dd   :  { %v1387_v22 = vsel %vm1384_vm10, %v1386_v12, %v1382_v8  ;;  %vm1404_vm1 = vcmp.eq.f32.partialorder %v1403_v42, 8.507059e+37 }
 0x3de   :  { %v1358_v62 = vmul.f32 %v2919_v35, %v1357_v59  ;;  %v1412_v14 = vmul.f32 %v1410_v24, %v1387_v22  ;;  %v1402_v51 = vsel %vm1401_vm15, %v2917_v29, %v1398_v19 }
 0x3e0   :  { %v1359_v21 = vadd.f32 %v2919_v35, %v1358_v62 }
 0x3e2   :  { %v1363_v58 = vsel %vm1362_vm11, %v2919_v35, %v1359_v21  ;;  %v1406_v35 = vor.u32 1.1754944e-38, %v1405_v10 }
 0x3e3   :  { %v1368_v18 = vsel %vm1365_vm12, %v1367_v11, %v1363_v58 }
 0x3e4   :  { %v1413_v30 = vmul.f32 %v2921_v23, %v1368_v18  ;;  %v1407_v34 = vsel %vm1404_vm1, %v1406_v35, %v1402_v51 }
 0x3e6   :  { %v3545_v43 = vadd.f32 %v1413_v30, %v1412_v14 }
 0x3e8   :  { %2922 = vtanh.f32 %v3545_v43  ;;  %v1549_v18 = vrot.slane %v3545_v43, 6 }
 0x3ee   :  { %v2923_v46 = vpop.eup %2922 }
 0x3ef   :  { %v1416_v1 = vmul.f32 %v2923_v46, %v1407_v34 }
 0x3f1   :  { %v1421_v36 = vpack.c.bf16 %v1416_v1, %v1416_v1 }
 0x3f3   :  { %1430 = vmatmul.bf16.vlgmr.msrb.gmra.mxu3 %v1421_v36  ;;  %1443 = vmatmul.bf16.vlgmr.msrb.gmra.mxu1 %v1421_v36 }
 0x3f4   :  { %1456 = vmatmul.bf16.vlgmr.msrb.gmra.mxu2 %v1421_v36  ;;  %1469 = vmatmul.bf16.vlgmr.msrb.gmra.mxu0 %v1421_v36 }
 0x3f5   :  { %1706 = vmatpush.bf16.msrb.mxu3 %v3231_v50  ;;  %1719 = vmatpush.bf16.msrb.mxu1 %v3250_v37 }
 0x3f6   :  { %1732 = vmatpush.bf16.msrb.mxu2 %v3248_v28  ;;  %1745 = vmatpush.bf16.msrb.mxu0 %v3288_v20 }
 0x3f9   :  { %1707 = vmatpush.bf16.msrb.mxu3 %v3237_v63  ;;  %1720 = vmatpush.bf16.msrb.mxu1 %v3259_v49 }
 0x3fa   :  { %1733 = vmatpush.bf16.msrb.mxu2 %v3256_v41  ;;  %1746 = vmatpush.bf16.msrb.mxu0 %v3298_v31 }
 0x3fd   :  { %1708 = vmatpush.bf16.msrb.mxu3 %v3241_v13  ;;  %1721 = vmatpush.bf16.msrb.mxu1 %v3271_v0 }
 0x3fe   :  { %1734 = vmatpush.bf16.msrb.mxu2 %v3265_v55  ;;  %1747 = vmatpush.bf16.msrb.mxu0 %v3309_v44 }
 0x401   :  { %1709 = vmatpush.bf16.msrb.mxu3 %v3246_v27  ;;  %1722 = vmatpush.bf16.msrb.mxu1 %v3280_v15  ;;  %v1418_v27 = vld [vmem:[#allocation2 + $0x20] sm:$0xc] }
 0x402   :  { %1735 = vmatpush.bf16.msrb.mxu2 %v3277_v4  ;;  %1748 = vmatpush.bf16.msrb.mxu0 %v3319_v57  ;;  %v1417_v4 = vld [vmem:[#allocation2 + $0x8] sm:$0xc] }
 0x405   :  { %1710 = vmatpush.bf16.msrb.mxu3 %v3254_v40  ;;  %1723 = vmatpush.bf16.msrb.mxu1 %v3291_v25  ;;  %v1420_v40 = vld [vmem:[#allocation2 + $0x38] sm:$0xc] }
 0x406   :  { %1736 = vmatpush.bf16.msrb.mxu2 %v3286_v17  ;;  %1749 = vmatpush.bf16.msrb.mxu0 %v3327_v61 }
 0x409   :  { %1711 = vmatpush.bf16.msrb.mxu3 %v3263_v54  ;;  %1724 = vmatpush.bf16.msrb.mxu1 %v3303_v38 }
 0x40a   :  { %1737 = vmatpush.bf16.msrb.mxu2 %v3295_v26  ;;  %1750 = vmatpush.bf16.msrb.mxu0 %v3334_v2 }
 0x40d   :  { %1712 = vmatpush.bf16.msrb.mxu3 %v3275_v3  ;;  %1725 = vmatpush.bf16.msrb.mxu1 %v3313_v48 }
 0x40e   :  { %1738 = vmatpush.bf16.msrb.mxu2 %v3306_v39  ;;  %1751 = vmatpush.bf16.msrb.mxu0 %v3340_v7 }
 0x411   :  { %1713 = vmatpush.bf16.msrb.mxu3 %v3284_v16  ;;  %1726 = vmatpush.bf16.msrb.mxu1 %v3323_v60 }
 0x412   :  { %1739 = vmatpush.bf16.msrb.mxu2 %v3316_v52  ;;  %1752 = vmatpush.bf16.msrb.mxu0 %v3346_v9 }
 0x470   :  { %v1444_v50 = vpop.f32.mrf.mxu1 }
 0x471   :  { %v1479_v63 = vrot.slane %v1444_v50, 6  ;;  %v1470_v13 = vpop.f32.mrf.mxu0 }
 0x472   :  { %v1481_v28 = vrot.slane %v1470_v13, 6 }
 0x473   :  { %v1487_v37 = vadd.f32 %v1479_v63, %v1418_v27 }
 0x474   :  { %v1489_v41 = vadd.f32 %v1481_v28, %v1420_v40 }
 0x475   :  { %v2544_v49 = vmul.f32 -1.442695, %v1487_v37 }
 0x476   :  { %v2545_v54 = vmul.f32 -1.442695, %v1489_v41  ;;  %v1431_v55 = vpop.f32.mrf.mxu3  ;;  %v1557_v41 = vld [vmem:[#allocation2 + $0x20] sm:$0x30] }
 0x477   :  { %2924 = vpow2.f32 %v2544_v49  ;;  %v1478_v0 = vrot.slane %v1431_v55, 6  ;;  %v1457_v3 = vpop.f32.mrf.mxu2  ;;  %v1559_v55 = vld [vmem:[#allocation2 + $0x38] sm:$0x30] }
 0x478   :  { %2926 = vpow2.f32 %v2545_v54  ;;  %v1446_v15 = vpop.f32.mrf.mxu1  ;;  %v1480_v61 = vrot.slane %v1457_v3, 6 }
 0x479   :  { %v1486_v16 = vadd.f32 %v1478_v0, %v1417_v4  ;;  %v1472_v17 = vpop.f32.mrf.mxu0 }
 0x47a   :  { %v1488_v47 = vadd.f32 %v1480_v61, %v1419_v32 }
 0x47b   :  { %v2543_v20 = vmul.f32 -1.442695, %v1486_v16 }
 0x47d   :  { %v2925_v25 = vpop.eup %2924  ;;  %2928 = vpow2.f32 %v2543_v20  ;;  %v1556_v20 = vld [vmem:[#allocation2 + $0x8] sm:$0x30] }
 0x47e   :  { %v2927_v26 = vpop.eup %2926  ;;  %v1512_v31 = vadd.f32 1.0, %v2925_v25  ;;  %v1433_v38 = vpop.f32.mrf.mxu3 }
 0x47f   :  { %v1459_v39 = vpop.f32.mrf.mxu2  ;;  %v1532_v44 = vadd.f32 1.0, %v2927_v26 }
 0x480   :  { %2930 = vrcp.f32 %v1512_v31  ;;  %v1524_v53 = vand.u32 2147483648, %v1512_v31  ;;  %vm1518_vm3 = vweird.f32 %v1512_v31  ;;  %v1522_v5 = vand.u32 2147483647, %v1512_v31 }
 0x481   :  { %2932 = vrcp.f32 %v1532_v44  ;;  %v1544_v46 = vand.u32 2147483648, %v1532_v44  ;;  %vm1538_vm11 = vweird.f32 %v1532_v44  ;;  %v1542_v34 = vand.u32 2147483647, %v1532_v44 }
 0x482   :  { %v1525_v11 = vor.u32 1.1754944e-38, %v1524_v53  ;;  %vm1523_vm7 = vcmp.eq.f32.partialorder %v1522_v5, 8.507059e+37 }
 0x483   :  { %v2929_v48 = vpop.eup %2928  ;;  %v1545_v36 = vor.u32 1.1754944e-38, %v1544_v46  ;;  %vm1543_vm13 = vcmp.eq.f32.partialorder %v1542_v34, 8.507059e+37 }
 0x484   :  { %v1493_v52 = vadd.f32 1.0, %v2929_v48 }
 0x486   :  { %v2931_v57 = vpop.eup %2930  ;;  %2934 = vrcp.f32 %v1493_v52  ;;  %v1505_v8 = vand.u32 2147483648, %v1493_v52  ;;  %v1503_v6 = vand.u32 2147483647, %v1493_v52  ;;  %vm1499_vm6 = vweird.f32 %v1493_v52 }
 0x487   :  { %v1514_v60 = vmul.f32 %v2931_v57, %v1512_v31  ;;  %v2933_v7 = vpop.eup %2932  ;;  %vm1519_vm2 = vweird.f32 %v2931_v57  ;;  %2936 = vtanh.f32 %v1488_v47 }
 0x488   :  { %v1534_v45 = vmul.f32 %v2933_v7, %v1532_v44  ;;  %vm1520_vm4 = vmor %vm1518_vm3, %vm1519_vm2  ;;  %v1506_v24 = vor.u32 1.1754944e-38, %v1505_v8  ;;  %vm1504_vm9 = vcmp.eq.f32.partialorder %v1503_v6, 8.507059e+37  ;;  %vm1539_vm10 = vweird.f32 %v2933_v7 }
 0x489   :  { %v1515_v2 = vsub.f32 1.0, %v1514_v60  ;;  %vm1540_vm12 = vmor %vm1538_vm11, %vm1539_vm10 }
 0x48a   :  { %v1535_v22 = vsub.f32 1.0, %v1534_v45 }
 0x48b   :  { %v1516_v9 = vmul.f32 %v2931_v57, %v1515_v2 }
 0x48c   :  { %v2935_v29 = vpop.eup %2934  ;;  %v1536_v19 = vmul.f32 %v2933_v7, %v1535_v22 }
 0x48d   :  { %v1495_v56 = vmul.f32 %v2935_v29, %v1493_v52  ;;  %v1517_v59 = vadd.f32 %v2931_v57, %v1516_v9  ;;  %vm1500_vm5 = vweird.f32 %v2935_v29  ;;  %v2937_v14 = vpop.eup %2936 }
 0x48e   :  { %vm1501_vm8 = vmor %vm1499_vm6, %vm1500_vm5  ;;  %v1537_v35 = vadd.f32 %v2933_v7, %v1536_v19 }
 0x48f   :  { %v1496_v62 = vsub.f32 1.0, %v1495_v56  ;;  %v1521_v21 = vsel %vm1520_vm4, %v2931_v57, %v1517_v59  ;;  %v1558_v59 = vld [vmem:[#allocation2 + $0x28] sm:$0x30] }
 0x490   :  { %v1526_v23 = vsel %vm1523_vm7, %v1525_v11, %v1521_v21  ;;  %v1541_v1 = vsel %vm1540_vm12, %v2933_v7, %v1537_v35 }
 0x491   :  { %v1497_v12 = vmul.f32 %v2935_v29, %v1496_v62  ;;  %v1551_v10 = vmul.f32 %v1549_v18, %v1526_v23  ;;  %v1546_v50 = vsel %vm1543_vm13, %v1545_v36, %v1541_v1 }
 0x493   :  { %v1498_v58 = vadd.f32 %v2935_v29, %v1497_v12 }
 0x495   :  { %v1502_v33 = vsel %vm1501_vm8, %v2935_v29, %v1498_v58 }
 0x496   :  { %v1507_v30 = vsel %vm1504_vm9, %v1506_v24, %v1502_v33 }
 0x497   :  { %v1552_v42 = vmul.f32 %v2937_v14, %v1507_v30 }
 0x499   :  { %v3581_v51 = vadd.f32 %v1552_v42, %v1551_v10 }
 0x49b   :  { %2938 = vtanh.f32 %v3581_v51  ;;  %v1691_v19 = vrot.slane %v3581_v51, 6 }
 0x4a1   :  { %v2939_v43 = vpop.eup %2938 }
 0x4a2   :  { %v1555_v63 = vmul.f32 %v2939_v43, %v1546_v50 }
 0x4a4   :  { %v1560_v13 = vpack.c.bf16 %v1555_v63, %v1555_v63 }
 0x4a6   :  { %v1562_v27 = vrot.slane %v1560_v13, 1 }
 0x4a8   :  { %1572 = vmatmul.bf16.vlgmr.msra.gmra.mxu3 %v1562_v27  ;;  %1585 = vmatmul.bf16.vlgmr.msra.gmra.mxu1 %v1562_v27 }
 0x4a9   :  { %1598 = vmatmul.bf16.vlgmr.msra.gmra.mxu2 %v1562_v27  ;;  %1611 = vmatmul.bf16.vlgmr.msra.gmra.mxu0 %v1562_v27 }
 0x525   :  { %v1586_v28 = vpop.f32.mrf.mxu1 }
 0x526   :  { %v1621_v37 = vrot.slane %v1586_v28, 4  ;;  %v1612_v40 = vpop.f32.mrf.mxu0 }
 0x527   :  { %v1623_v49 = vrot.slane %v1612_v40, 4 }
 0x528   :  { %v1629_v54 = vadd.f32 %v1621_v37, %v1557_v41 }
 0x529   :  { %v1631_v0 = vadd.f32 %v1623_v49, %v1559_v55  ;;  %v2694_v49 = vld [vmem:[#allocation11 + $0x118] sm:$0xf] }
 0x52a   :  { %v2547_v3 = vmul.f32 -1.442695, %v1629_v54  ;;  %v2827_v54 = vld [vmem:[#allocation11 + $0x128] sm:$0xf0] }
 0x52b   :  { %v2548_v4 = vmul.f32 -1.442695, %v1631_v0  ;;  %v1573_v15 = vpop.f32.mrf.mxu3  ;;  %v2695_v55 = vor.u32 %v2827_v54, %v2694_v49  ;;  %v2674_v0 = vld [vmem:[#allocation11 + $0xf0] sm:$0xf] }
 0x52c   :  { %2940 = vpow2.f32 %v2547_v3  ;;  %v1620_v16 = vrot.slane %v1573_v15, 4  ;;  %v1599_v17 = vpop.f32.mrf.mxu2  ;;  %v2822_v3 = vld [vmem:[#allocation11 + $0x100] sm:$0xf0]  ;;  %v2654_v15 = vld [vmem:[#allocation11 + $0xc8] sm:$0xf] }
 0x52d   :  { %2942 = vpow2.f32 %v2548_v4  ;;  %v1588_v25 = vpop.f32.mrf.mxu1  ;;  %v1622_v32 = vrot.slane %v1599_v17, 4  ;;  %2112 = vmatpush.bf16.msra.mxu3 %v2695_v55  ;;  %v2675_v4 = vor.u32 %v2822_v3, %v2674_v0 }
 0x52e   :  { %v1628_v26 = vadd.f32 %v1620_v16, %v1556_v20  ;;  %v1614_v31 = vpop.f32.mrf.mxu0  ;;  %v2817_v16 = vld [vmem:[#allocation11 + $0xd8] sm:$0xf0]  ;;  %v2634_v20 = vld [vmem:[#allocation11 + $0xa0] sm:$0xf]  ;;  %v2812_v25 = vld [vmem:[#allocation11 + $0xb0] sm:$0xf0] }
 0x52f   :  { %v1630_v45 = vadd.f32 %v1622_v32, %v1558_v59  ;;  %v2655_v17 = vor.u32 %v2817_v16, %v2654_v15  ;;  %v2825_v31 = vld [vmem:[#allocation11 + $0x11c] sm:$0xf]  ;;  %v2820_v32 = vld [vmem:[#allocation11 + $0xf4] sm:$0xf]  ;;  %v2823_v59 = vld [vmem:[#allocation11 + $0x108] sm:$0xf0] }
 0x530   :  { %v2546_v38 = vmul.f32 -1.442695, %v1628_v26  ;;  %v2635_v26 = vor.u32 %v2812_v25, %v2634_v20  ;;  %v2792_v15 = vld [vmem:[#allocation11 + $0x10] sm:$0xf0]  ;;  %v2805_v25 = vld [vmem:[#allocation11 + $0x7c] sm:$0xf] }
 0x531   :  { %2113 = vmatpush.bf16.msra.mxu3 %v2675_v4  ;;  %v2554_v4 = vld [vmem:[#allocation11] sm:$0xf] }
 0x532   :  { %v2941_v39 = vpop.eup %2940  ;;  %2944 = vpow2.f32 %v2546_v38  ;;  %v2696_v38 = vld [vmem:[#allocation11 + $0x12c] sm:$0xf0]  ;;  %v2555_v20 = vor.u32 %v2792_v15, %v2554_v4  ;;  %v2814_v4 = vld [vmem:[#allocation11 + $0xc0] sm:$0xf0] }
 0x533   :  { %v2943_v44 = vpop.eup %2942  ;;  %v1654_v48 = vadd.f32 1.0, %v2941_v39  ;;  %v1575_v52 = vpop.f32.mrf.mxu3  ;;  %v2702_v39 = vld [vmem:[#allocation11 + $0x120] sm:$0xf] }
 0x534   :  { %v1601_v57 = vpop.f32.mrf.mxu2  ;;  %v1674_v60 = vadd.f32 1.0, %v2943_v44  ;;  %v2699_v44 = vor.u32 %v2825_v31, %v2696_v38  ;;  %v2826_v52 = vld [vmem:[#allocation11 + $0x124] sm:$0xf]  ;;  %v1698_v31 = vld [vmem:[#allocation2 + $0x8] sm:$0xc0] }
 0x535   :  { %2946 = vrcp.f32 %v1654_v48  ;;  %v1666_v8 = vand.u32 2147483648, %v1654_v48  ;;  %vm1660_vm15 = vweird.f32 %v1654_v48  ;;  %v1664_v21 = vand.u32 2147483647, %v1654_v48  ;;  %2114 = vmatpush.bf16.msra.mxu3 %v2655_v17  ;;  %v2704_v57 = vld [vmem:[#allocation11 + $0x134] sm:$0xf0] }
 0x536   :  { %2948 = vrcp.f32 %v1674_v60  ;;  %v1686_v50 = vand.u32 2147483648, %v1674_v60  ;;  %vm1680_vm8 = vweird.f32 %v1674_v60  ;;  %v1684_v63 = vand.u32 2147483647, %v1674_v60  ;;  %2125 = vmatpush.bf16.msra.mxu1 %v2699_v44  ;;  %v2622_v44 = vld [vmem:[#allocation11 + $0x80] sm:$0xf] }
 0x537   :  { %v1667_v23 = vor.u32 1.1754944e-38, %v1666_v8  ;;  %vm1665_vm4 = vcmp.eq.f32.partialorder %v1664_v21, 8.507059e+37  ;;  %v2594_v8 = vld [vmem:[#allocation11 + $0x50] sm:$0xf]  ;;  %v2815_v21 = vld [vmem:[#allocation11 + $0xcc] sm:$0xf] }
 0x538   :  { %v2945_v61 = vpop.eup %2944  ;;  %v1687_v27 = vor.u32 1.1754944e-38, %v1686_v50  ;;  %vm1685_vm10 = vcmp.eq.f32.partialorder %v1684_v63, 8.507059e+37  ;;  %v2810_v63 = vld [vmem:[#allocation11 + $0xa4] sm:$0xf] }
 0x539   :  { %v1635_v2 = vadd.f32 1.0, %v2945_v61  ;;  %2115 = vmatpush.bf16.msra.mxu3 %v2635_v26  ;;  %v2707_v61 = vor.u32 %v2826_v52, %v2704_v57  ;;  %v2616_v26 = vld [vmem:[#allocation11 + $0x8c] sm:$0xf0] }
 0x53b   :  { %v2947_v7 = vpop.eup %2946  ;;  %2950 = vrcp.f32 %v1635_v2  ;;  %v1647_v11 = vand.u32 2147483648, %v1635_v2  ;;  %v1645_v58 = vand.u32 2147483647, %v1635_v2  ;;  %vm1641_vm3 = vweird.f32 %v1635_v2  ;;  %2151 = vmatpush.bf16.msra.mxu0 %v2707_v61  ;;  %v2806_v61 = vld [vmem:[#allocation11 + $0x84] sm:$0xf] }
 0x53c   :  { %v1656_v9 = vmul.f32 %v2947_v7, %v1654_v48  ;;  %v2949_v47 = vpop.eup %2948  ;;  %vm1661_vm14 = vweird.f32 %v2947_v7  ;;  %2952 = vtanh.f32 %v1630_v45  ;;  %v2828_v48 = vld [vmem:[#allocation11 + $0x130] sm:$0xf0]  ;;  %v2684_v45 = vld [vmem:[#allocation11 + $0x10c] sm:$0xf0] }
 0x53d   :  { %v1676_v12 = vmul.f32 %v2949_v47, %v1674_v60  ;;  %vm1662_vm1 = vmor %vm1660_vm15, %vm1661_vm14  ;;  %v1648_v14 = vor.u32 1.1754944e-38, %v1647_v11  ;;  %vm1646_vm6 = vcmp.eq.f32.partialorder %v1645_v58, 8.507059e+37  ;;  %vm1681_vm7 = vweird.f32 %v2949_v47  ;;  %v2656_v11 = vld [vmem:[#allocation11 + $0xdc] sm:$0xf0] }
 0x53e   :  { %v1657_v29 = vsub.f32 1.0, %v1656_v9  ;;  %vm1682_vm9 = vmor %vm1680_vm8, %vm1681_vm7  ;;  %v2703_v60 = vor.u32 %v2828_v48, %v2702_v39  ;;  %v2619_v39 = vor.u32 %v2805_v25, %v2616_v26  ;;  %v2808_v48 = vld [vmem:[#allocation11 + $0x90] sm:$0xf0]  ;;  %vm2184_vm8 = vcmask 1041408  }
 0x53f   :  { %v1677_v18 = vsub.f32 1.0, %v1676_v12  ;;  %v2802_v12 = vld [vmem:[#allocation11 + $0x60] sm:$0xf0] }
 0x540   :  { %v1658_v56 = vmul.f32 %v2947_v7, %v1657_v29  ;;  %2138 = vmatpush.bf16.msra.mxu2 %v2703_v60  ;;  %v2676_v29 = vld [vmem:[#allocation11 + $0x104] sm:$0xf0]  ;;  %v2623_v60 = vor.u32 %v2808_v48, %v2622_v44  ;;  %v2610_v44 = vld [vmem:[#allocation11 + $0x60] sm:$0xf] }
 0x541   :  { %v2951_v53 = vpop.eup %2950  ;;  %v1678_v46 = vmul.f32 %v2949_v47, %v1677_v18  ;;  %v2816_v18 = vld [vmem:[#allocation11 + $0xd4] sm:$0xf] }
 0x542   :  { %v1637_v62 = vmul.f32 %v2951_v53, %v1635_v2  ;;  %v1659_v5 = vadd.f32 %v2947_v7, %v1658_v56  ;;  %vm1642_vm2 = vweird.f32 %v2951_v53  ;;  %v2953_v42 = vpop.eup %2952  ;;  %v2614_v2 = vld [vmem:[#allocation11 + $0x78] sm:$0xf]  ;;  %v2679_v56 = vor.u32 %v2820_v32, %v2676_v29  ;;  %v2829_v32 = vld [vmem:[#allocation11 + $0x138] sm:$0xf0] }
 0x543   :  { %vm1643_vm5 = vmor %vm1641_vm3, %vm1642_vm2  ;;  %v1679_v43 = vadd.f32 %v2949_v47, %v1678_v46 }
 0x544   :  { %v1638_v6 = vsub.f32 1.0, %v1637_v62  ;;  %v1663_v24 = vsel %vm1662_vm1, %v2947_v7, %v1659_v5  ;;  %v2807_v7 = vld [vmem:[#allocation11 + $0x88] sm:$0xf0]  ;;  %2126 = vmatpush.bf16.msra.mxu1 %v2679_v56  ;;  %v2800_v56 = vld [vmem:[#allocation11 + $0x54] sm:$0xf] }
 0x545   :  { %v1668_v30 = vsel %vm1665_vm4, %v1667_v23, %v1663_v24  ;;  %v1683_v13 = vsel %vm1682_vm9, %v2949_v47, %v1679_v43  ;;  %v2615_v9 = vor.u32 %v2807_v7, %v2614_v2  ;;  %v2682_v47 = vld [vmem:[#allocation11 + $0xf8] sm:$0xf]  ;;  %v2659_v24 = vor.u32 %v2815_v21, %v2656_v11  ;;  %v2818_v23 = vld [vmem:[#allocation11 + $0xe0] sm:$0xf0]  ;;  %v2710_v7 = vld [vmem:[#allocation11 + $0x128] sm:$0xf] }
 0x546   :  { %v1639_v22 = vmul.f32 %v2951_v53, %v1638_v6  ;;  %v1693_v34 = vmul.f32 %v1691_v19, %v1668_v30  ;;  %v1688_v28 = vsel %vm1685_vm10, %v1687_v27, %v1683_v13  ;;  %v2683_v62 = vor.u32 %v2823_v59, %v2682_v47  ;;  %v1701_v19 = vld [vmem:[#allocation2 + $0x38] sm:$0xc0]  ;;  %v2642_v27 = vld [vmem:[#allocation11 + $0xa8] sm:$0xf]  ;;  %v2690_v21 = vld [vmem:[#allocation11 + $0x100] sm:$0xf] }
 0x547   :  { %2116 = vmatpush.bf16.msra.mxu3 %v2615_v9  ;;  %v2595_v6 = vor.u32 %v2802_v12, %v2594_v8  ;;  %v2636_v13 = vld [vmem:[#allocation11 + $0xb4] sm:$0xf0]  ;;  %v2711_v47 = vor.u32 %v2829_v32, %v2710_v7  ;;  %v2596_v59 = vld [vmem:[#allocation11 + $0x64] sm:$0xf0]  ;;  %v2824_v11 = vld [vmem:[#allocation11 + $0x110] sm:$0xf0] }
 0x548   :  { %v1640_v33 = vadd.f32 %v2951_v53, %v1639_v22  ;;  %2139 = vmatpush.bf16.msra.mxu2 %v2683_v62  ;;  %v2662_v22 = vld [vmem:[#allocation11 + $0xd0] sm:$0xf]  ;;  %2127 = vmatpush.bf16.msra.mxu1 %v2659_v24  ;;  %v2624_v2 = vld [vmem:[#allocation11 + $0x94] sm:$0xf0]  ;;  %v2803_v62 = vld [vmem:[#allocation11 + $0x68] sm:$0xf0] }
 0x549   :  { %v2627_v9 = vor.u32 %v2806_v61, %v2624_v2  ;;  %v2804_v61 = vld [vmem:[#allocation11 + $0x70] sm:$0xf0]  ;;  %vm2186_vm9 = vcmask 1045508  }
 0x54a   :  { %v1644_v10 = vsel %vm1643_vm5, %v2951_v53, %v1640_v33  ;;  %v2821_v53 = vld [vmem:[#allocation11 + $0xfc] sm:$0xf]  ;;  %v2664_v33 = vld [vmem:[#allocation11 + $0xe4] sm:$0xf0] }
 0x54b   :  { %v1649_v35 = vsel %vm1646_vm6, %v1648_v14, %v1644_v10  ;;  %v2687_v5 = vor.u32 %v2821_v53, %v2684_v45  ;;  %v1699_v14 = vld [vmem:[#allocation2 + $0x20] sm:$0xc0]  ;;  %2117 = vmatpush.bf16.msra.mxu3 %v2595_v6  ;;  %v2599_v53 = vor.u32 %v2800_v56, %v2596_v59  ;;  %v2602_v45 = vld [vmem:[#allocation11 + $0x58] sm:$0xf]  ;;  %v2604_v6 = vld [vmem:[#allocation11 + $0x6c] sm:$0xf0] }
 0x54c   :  { %v1694_v1 = vmul.f32 %v2953_v42, %v1649_v35  ;;  %v2663_v42 = vor.u32 %v2818_v23, %v2662_v22  ;;  %v2667_v35 = vor.u32 %v2816_v18, %v2664_v33  ;;  %v2603_v12 = vor.u32 %v2803_v62, %v2602_v45  ;;  %v2795_v33 = vld [vmem:[#allocation11 + $0x2c] sm:$0xf]  ;;  %v2590_v56 = vld [vmem:[#allocation11 + $0x38] sm:$0xf] }
 0x54d   :  { %2152 = vmatpush.bf16.msra.mxu0 %v2687_v5  ;;  %v2801_v5 = vld [vmem:[#allocation11 + $0x5c] sm:$0xf]  ;;  %v2691_v18 = vor.u32 %v2824_v11, %v2690_v21  ;;  %v2799_v59 = vld [vmem:[#allocation11 + $0x48] sm:$0xf0] }
 0x54e   :  { %v3585_v36 = vadd.f32 %v1694_v1, %v1693_v34  ;;  %v2574_v34 = vld [vmem:[#allocation11 + $0x28] sm:$0xf]  ;;  %v2797_v1 = vld [vmem:[#allocation11 + $0x38] sm:$0xf0]  ;;  %2140 = vmatpush.bf16.msra.mxu2 %v2663_v42  ;;  %v2607_v23 = vor.u32 %v2801_v5, %v2604_v6  ;;  %v2798_v42 = vld [vmem:[#allocation11 + $0x40] sm:$0xf0]  ;;  %v2591_v21 = vor.u32 %v2799_v59, %v2590_v56 }
 0x54f   :  { %v2575_v50 = vor.u32 %v2797_v1, %v2574_v34  ;;  %v2584_v1 = vld [vmem:[#allocation11 + $0x44] sm:$0xf0] }
 0x550   :  { %2954 = vtanh.f32 %v3585_v36 }
 0x551   :  { %2153 = vmatpush.bf16.msra.mxu0 %v2667_v35  ;;  %2118 = vmatpush.bf16.msra.mxu3 %v2575_v50  ;;  %v2796_v35 = vld [vmem:[#allocation11 + $0x34] sm:$0xf] }
 0x552   :  { %v2587_v50 = vor.u32 %v2796_v35, %v2584_v1 }
 0x555   :  { %2119 = vmatpush.bf16.msra.mxu3 %v2555_v20 }
 0x556   :  { %v2955_v51 = vpop.eup %2954 }
 0x557   :  { %v1697_v37 = vmul.f32 %v2955_v51, %v1688_v28  ;;  %v2639_v28 = vor.u32 %v2810_v63, %v2636_v13  ;;  %v2819_v63 = vld [vmem:[#allocation11 + $0xe8] sm:$0xf0]  ;;  %v2790_v13 = vld [vmem:[#allocation11 + $0x4] sm:$0xf] }
 0x559   :  { %v1702_v40 = vpack.c.bf16 %v1697_v37, %v1697_v37  ;;  %v2813_v37 = vld [vmem:[#allocation11 + $0xb8] sm:$0xf0]  ;;  %2128 = vmatpush.bf16.msra.mxu1 %v2639_v28  ;;  %v2556_v28 = vld [vmem:[#allocation11 + $0x14] sm:$0xf0] }
 0x55a   :  { %v2643_v54 = vor.u32 %v2813_v37, %v2642_v27  ;;  %v2562_v37 = vld [vmem:[#allocation11 + $0x8] sm:$0xf] }
 0x55b   :  { %v1704_v41 = vrot.slane %v1702_v40, 2  ;;  %v2811_v40 = vld [vmem:[#allocation11 + $0xac] sm:$0xf] }
 0x55c   :  { %2141 = vmatpush.bf16.msra.mxu2 %v2643_v54  ;;  %v2791_v54 = vld [vmem:[#allocation11 + $0xc] sm:$0xf] }
 0x55d   :  { %1714 = vmatmul.bf16.vlgmr.msrb.gmra.mxu3 %v1704_v41  ;;  %1727 = vmatmul.bf16.vlgmr.msrb.gmra.mxu1 %v1704_v41 }
 0x55e   :  { %1740 = vmatmul.bf16.vlgmr.msrb.gmra.mxu2 %v1704_v41  ;;  %1753 = vmatmul.bf16.vlgmr.msrb.gmra.mxu0 %v1704_v41  ;;  %v2644_v41 = vld [vmem:[#allocation11 + $0xbc] sm:$0xf0] }
 0x55f   :  { %v2647_v55 = vor.u32 %v2811_v40, %v2644_v41  ;;  %2129 = vmatpush.bf16.msra.mxu1 %v2619_v39  ;;  %2164 = vmatpush.bf16.msrb.mxu3 %v2711_v47  ;;  %v2559_v41 = vor.u32 %v2790_v13, %v2556_v28  ;;  %v2809_v39 = vld [vmem:[#allocation11 + $0x98] sm:$0xf0] }
 0x560   :  { %2142 = vmatpush.bf16.msra.mxu2 %v2623_v60 }
 0x561   :  { %2154 = vmatpush.bf16.msra.mxu0 %v2647_v55 }
 0x563   :  { %2130 = vmatpush.bf16.msra.mxu1 %v2599_v53  ;;  %2165 = vmatpush.bf16.msrb.mxu3 %v2691_v18 }
 0x564   :  { %2143 = vmatpush.bf16.msra.mxu2 %v2603_v12 }
 0x565   :  { %2155 = vmatpush.bf16.msra.mxu0 %v2627_v9 }
 0x569   :  { %2156 = vmatpush.bf16.msra.mxu0 %v2607_v23 }
 0x56d   :  { %2157 = vmatpush.bf16.msra.mxu0 %v2587_v50 }
 0x5da   :  { %v1728_v58 = vpop.f32.mrf.mxu1 }
 0x5db   :  { %v1763_v30 = vrot.slane %v1728_v58, 2  ;;  %v1754_v10 = vpop.f32.mrf.mxu0 }
 0x5dc   :  { %v1765_v46 = vrot.slane %v1754_v10, 2  ;;  %v2582_v10 = vld [vmem:[#allocation11 + $0x30] sm:$0xf] }
 0x5dd   :  { %v1771_v43 = vadd.f32 %v1763_v30, %v1699_v14  ;;  %v2576_v14 = vld [vmem:[#allocation11 + $0x3c] sm:$0xf0]  ;;  %v2583_v34 = vor.u32 %v2798_v42, %v2582_v10 }
 0x5de   :  { %v1773_v51 = vadd.f32 %v1765_v46, %v1701_v19  ;;  %v2579_v19 = vor.u32 %v2795_v33, %v2576_v14  ;;  %v1833_v14 = vrot.slane %v3585_v36, 6 }
 0x5df   :  { %v2550_v49 = vmul.f32 -1.442695, %v1771_v43  ;;  %v2670_v43 = vld [vmem:[#allocation11 + $0xd8] sm:$0xf]  ;;  %2144 = vmatpush.bf16.msra.mxu2 %v2583_v34 }
 0x5e0   :  { %v2551_v0 = vmul.f32 -1.442695, %v1773_v51  ;;  %v1715_v3 = vpop.f32.mrf.mxu3  ;;  %2131 = vmatpush.bf16.msra.mxu1 %v2579_v19  ;;  %v2671_v51 = vor.u32 %v2819_v63, %v2670_v43 }
 0x5e1   :  { %2956 = vpow2.f32 %v2550_v49  ;;  %v1762_v16 = vrot.slane %v1715_v3, 2  ;;  %v3588_v17 = vpop.f32.mrf.mxu2  ;;  %v2793_v49 = vld [vmem:[#allocation11 + $0x18] sm:$0xf0]  ;;  %v2650_v3 = vld [vmem:[#allocation11 + $0xb0] sm:$0xf] }
 0x5e2   :  { %2958 = vpow2.f32 %v2551_v0  ;;  %v1730_v38 = vpop.f32.mrf.mxu1  ;;  %2166 = vmatpush.bf16.msrb.mxu3 %v2671_v51  ;;  %v2563_v55 = vor.u32 %v2793_v49, %v2562_v37  ;;  %v2564_v0 = vld [vmem:[#allocation11 + $0x1c] sm:$0xf0]  ;;  %v2651_v25 = vor.u32 %v2814_v4, %v2650_v3  ;;  %v1764_v26 = vrot.slane %v3588_v17, 2 }
 0x5e3   :  { %v1770_v52 = vadd.f32 %v1762_v16, %v1698_v31  ;;  %v1756_v57 = vpop.f32.mrf.mxu0  ;;  %v2567_v20 = vor.u32 %v2791_v54, %v2564_v0  ;;  %v2630_v38 = vld [vmem:[#allocation11 + $0x88] sm:$0xf]  ;;  %v2611_v17 = vor.u32 %v2804_v61, %v2610_v44  ;;  %v1889_v49 = vld [vmem:[#allocation12] sm:$0x1f] }
 0x5e4   :  { %2132 = vmatpush.bf16.msra.mxu1 %v2559_v41  ;;  %2145 = vmatpush.bf16.msra.mxu2 %v2563_v55  ;;  %v1700_v57 = vld [vmem:[#allocation2 + $0x28] sm:$0xc0]  ;;  %v2631_v60 = vor.u32 %v2809_v39, %v2630_v38  ;;  %v1892_v0 = vperm.slane %v1889_v49, 1  ;;  %v1891_v3 = vperm.slane %v1889_v49, 0  ;;  %v1893_v4 = vperm.slane %v1889_v49, 2 }
 0x5e5   :  { %v2549_v29 = vmul.f32 -1.442695, %v1770_v52  ;;  %2158 = vmatpush.bf16.msra.mxu0 %v2567_v20  ;;  %v1772_v7 = vadd.f32 %v1764_v26, %v1700_v57 }
 0x5e6   :  { %2167 = vmatpush.bf16.msrb.mxu3 %v2651_v25 }
 0x5e7   :  { %v2957_v8 = vpop.eup %2956  ;;  %2960 = vpow2.f32 %v2549_v29 }
 0x5e8   :  { %v2959_v22 = vpop.eup %2958  ;;  %v3590_v58 = vadd.f32 1.0, %v2957_v8  ;;  %v1717_v24 = vpop.f32.mrf.mxu3 }
 0x5e9   :  { %v1743_v30 = vpop.f32.mrf.mxu2  ;;  %v3593_v46 = vadd.f32 1.0, %v2959_v22  ;;  %v2570_v24 = vld [vmem:[#allocation11 + $0x10] sm:$0xf] }
 0x5ea   :  { %2962 = vrcp.f32 %v3590_v58  ;;  %2168 = vmatpush.bf16.msrb.mxu3 %v2631_v60  ;;  %v1808_v29 = vand.u32 2147483648, %v3590_v58  ;;  %vm1802_vm12 = vweird.f32 %v3590_v58  ;;  %v1806_v45 = vand.u32 2147483647, %v3590_v58 }
 0x5eb   :  { %2964 = vrcp.f32 %v3593_v46  ;;  %v1828_v63 = vand.u32 2147483648, %v3593_v46  ;;  %vm1822_vm5 = vweird.f32 %v3593_v46  ;;  %v1826_v36 = vand.u32 2147483647, %v3593_v46 }
 0x5ec   :  { %v1809_v11 = vor.u32 1.1754944e-38, %v1808_v29  ;;  %vm1807_vm1 = vcmp.eq.f32.partialorder %v1806_v45, 8.507059e+37 }
 0x5ed   :  { %v2961_v27 = vpop.eup %2960  ;;  %vm1827_vm7 = vcmp.eq.f32.partialorder %v1826_v36, 8.507059e+37 }
 0x5ee   :  { %v3595_v40 = vadd.f32 1.0, %v2961_v27  ;;  %2169 = vmatpush.bf16.msrb.mxu3 %v2611_v17  ;;  %v1829_v27 = vor.u32 1.1754944e-38, %v1828_v63 }
 0x5f0   :  { %v2963_v15 = vpop.eup %2962  ;;  %2966 = vrcp.f32 %v3595_v40  ;;  %v1787_v5 = vand.u32 2147483647, %v3595_v40  ;;  %v1789_v8 = vand.u32 2147483648, %v3595_v40  ;;  %vm1783_vm15 = vweird.f32 %v3595_v40 }
 0x5f1   :  { %v1798_v16 = vmul.f32 %v2963_v15, %v3590_v58  ;;  %v3601_v48 = vpop.eup %2964  ;;  %vm1803_vm11 = vweird.f32 %v2963_v15  ;;  %2968 = vtanh.f32 %v1772_v7  ;;  %v2794_v58 = vld [vmem:[#allocation11 + $0x20] sm:$0xf0] }
 0x5f2   :  { %v1818_v47 = vmul.f32 %v3601_v48, %v3593_v46  ;;  %vm3609_vm13 = vmor %vm1802_vm12, %vm1803_vm11  ;;  %v1790_v18 = vor.u32 1.1754944e-38, %v1789_v8  ;;  %vm1788_vm3 = vcmp.eq.f32.partialorder %v1787_v5, 8.507059e+37  ;;  %2170 = vmatpush.bf16.msrb.mxu3 %v2591_v21  ;;  %v2571_v19 = vor.u32 %v2794_v58, %v2570_v24 }
 0x5f3   :  { %v1799_v31 = vsub.f32 1.0, %v1798_v16  ;;  %vm1823_vm4 = vweird.f32 %v3601_v48  ;;  %v1894_v46 = vperm.slane %v1889_v49, 3 }
 0x5f4   :  { %v1819_v22 = vsub.f32 1.0, %v1818_v47  ;;  %vm1824_vm6 = vmor %vm1822_vm5, %vm1823_vm4 }
 0x5f5   :  { %v1800_v52 = vmul.f32 %v2963_v15, %v1799_v31 }
 0x5f6   :  { %v2967_v2 = vpop.eup %2966  ;;  %v1820_v42 = vmul.f32 %v3601_v48, %v1819_v22  ;;  %2171 = vmatpush.bf16.msrb.mxu3 %v2571_v19 }
 0x5f7   :  { %v1779_v9 = vmul.f32 %v2967_v2, %v3595_v40  ;;  %v1801_v32 = vadd.f32 %v2963_v15, %v1800_v52  ;;  %vm1784_vm14 = vweird.f32 %v2967_v2  ;;  %v2969_v10 = vpop.eup %2968 }
 0x5f8   :  { %vm1785_vm2 = vmor %vm1783_vm15, %vm1784_vm14  ;;  %v1821_v50 = vadd.f32 %v3601_v48, %v1820_v42 }
 0x5f9   :  { %v1780_v53 = vsub.f32 1.0, %v1779_v9  ;;  %v1805_v6 = vsel %vm3609_vm13, %v2963_v15, %v1801_v32  ;;  %v1895_v9 = vperm.slane %v1889_v49, 4 }
 0x5fa   :  { %v1810_v33 = vsel %vm1807_vm1, %v1809_v11, %v1805_v6  ;;  %v1825_v13 = vsel %vm1824_vm6, %v3601_v48, %v1821_v50 }
 0x5fb   :  { %v1781_v12 = vmul.f32 %v2967_v2, %v1780_v53  ;;  %v1835_v34 = vmul.f32 %v1833_v14, %v1810_v33  ;;  %v1830_v28 = vsel %vm1827_vm7, %v1829_v27, %v1825_v13 }
 0x5fd   :  { %v1782_v23 = vadd.f32 %v2967_v2, %v1781_v12 }
 0x5ff   :  { %v1786_v30 = vsel %vm1785_vm2, %v2967_v2, %v1782_v23 }
 0x600   :  { %v1791_v35 = vsel %vm1788_vm3, %v1790_v18, %v1786_v30 }
 0x601   :  { %v1836_v1 = vmul.f32 %v2969_v10, %v1791_v35 }
 0x603   :  { %v1837_v43 = vadd.f32 %v1836_v1, %v1835_v34 }
 0x605   :  { %2970 = vtanh.f32 %v1837_v43 }
 0x60b   :  { %v2971_v51 = vpop.eup %2970 }
 0x60c   :  { %v1839_v37 = vmul.f32 %v2971_v51, %v1830_v28 }
 0x60e   :  { %v1840_v40 = vpack.c.bf16 %v1839_v37, %v1839_v37 }
 0x610   :  { %v1902_v41 = vrot.slane %v1840_v40, 3 }
 0x612   :  { %2120 = vmatmul.bf16.vlgmr.msra.gmra.mxu3 %v1902_v41  ;;  %2133 = vmatmul.bf16.vlgmr.msra.gmra.mxu1 %v1902_v41 }
 0x613   :  { %2146 = vmatmul.bf16.vlgmr.msra.gmra.mxu2 %v1902_v41  ;;  %2159 = vmatmul.bf16.vlgmr.msra.gmra.mxu0 %v1902_v41 }
 0x622   :  { %2172 = vmatmul.bf16.vlgmr.msrb.gmra.mxu3 %v1902_v41 }
 0x68f   :  { %v2134_v54 = vpop.f32.mrf.mxu1 }
 0x690   :  { %v2160_v55 = vpop.f32.mrf.mxu0  ;;  %v2135_v15 = vadd.f32 %v2134_v54, %v1892_v0 }
 0x691   :  { %v2161_v16 = vadd.f32 %v2160_v55, %v1894_v46 }
 0x692   :  { %v2181_v44 = vrot.slane %v2135_v15, 6 }
 0x693   :  { %v2183_v48 = vrot.slane %v2161_v16, 2 }
 0x695   :  { %v2121_v20 = vpop.f32.mrf.mxu3 }
 0x696   :  { %v2147_v25 = vpop.f32.mrf.mxu2  ;;  %v2122_v26 = vadd.f32 %v2121_v20, %v1891_v3 }
 0x697   :  { %v2148_v31 = vadd.f32 %v2147_v25, %v1893_v4  ;;  %v2136_v38 = vpop.f32.mrf.mxu1 }
 0x698   :  { %v2162_v39 = vpop.f32.mrf.mxu0  ;;  %v2185_v57 = vsel %vm2184_vm8, %v2122_v26, %v2181_v44 }
 0x699   :  { %v2182_v52 = vrot.slane %v2148_v31, 4 }
 0x69b   :  { %v2187_v60 = vsel %vm2186_vm9, %v2182_v52, %v2183_v48 }
 0x69c   :  { %v2188_v61 = vsel %vm416_vm0, %v2185_v57, %v2187_v60 }
 0x69d   :  { %v2123_v2 = vpop.f32.mrf.mxu3  ;;  %2190 = vst [vmem:[#allocation14] sm:$0xff] %v2188_v61 }
 0x69e   :  { %v2149_v7 = vpop.f32.mrf.mxu2 }
 0x6a5   :  { %v2173_v32 = vpop.f32.mrf.mxu3 }
 0x6a6   :  { %v2174_v17 = vadd.f32 %v2173_v32, %v1895_v9 }
 0x6a8   :  { %2191 = vst [vmem:[#allocation14 + $0x8] sm:$0x3] %v2174_v17 }
 0x6a9   :  { %2202 = dma.vmem_to_hbm [thread:$0]  %s2198_s5, 160, %s2200_s7, [#allocation5]  }
 0x6ad   :  { %v2175_v29 = vpop.f32.mrf.mxu3 }
 0x6ae   :  { %3148 = dma.done.wait [#allocation5], 160  }
 0x6af   :  { %3149 = vsyncadd [#allocation5], 4294967136 }
 0x6b0   :  { %2207 = vsyncpa [#allocation4], 1 }
 0x6b1   :  { %2208 = vsyncpa [#allocation7], 1 }
 0x6b2   :  { %2209 = vsyncpa [#allocation10], 1 }
 0x6b3   :  { %2210 = vsyncpa [#allocation13], 1 }
 0x6b4   :  { %2211 = vsyncpa [#allocation5], 1 }

</bundles_post_ra>
